<compile_context>
chip_gen: v6e
topology: v6e:2x2x1
jax: 0.10.0
libtpu: 0.0.40
codegen_flags: <defaults>
</compile_context>

<pallas_src>
import functools
import math

import jax
import jax.numpy as jnp
from jax.experimental import pallas as pl
from jax.experimental.pallas import tpu as pltpu


def mheda_kernel(q_ref, kt_ref, v_ref, wo_ref, bo_ref, o_ref,
                 m_sc, l_sc, acc_sc, *, approx_recip):
    """Grid = (batch, T1 tiles, T2 chunks).  Per step:

    q_ref : [1, H, tq, dh]   decoder queries (head-split, wrapper-cast)
    kt_ref: [1, H, dh, tk]   encoder keys, pre-transposed (dh on sublanes)
    v_ref : [1, H, tk, dh]   encoder values
    wo_ref: [H, dh, E]       output projection (head-major rows of Wo[in,out])
    bo_ref: [1, E]           output bias (f32)
    o_ref : [1, tq, E]       resident across the KV axis; written at finalize
    m_sc  : [H, tq, 1]  f32  running row max
    l_sc  : [H, tq, 1]  f32  running softmax denominator
    acc_sc: [H, tq, dh] f32  running (unnormalised) context
    """
    kv_step = pl.program_id(2)

    @pl.when(kv_step == 0)
    def _init():
        m_sc[...] = jnp.full(m_sc.shape, -jnp.inf, dtype=m_sc.dtype)
        l_sc[...] = jnp.zeros(l_sc.shape, dtype=l_sc.dtype)
        acc_sc[...] = jnp.zeros(acc_sc.shape, dtype=acc_sc.dtype)

    q = q_ref[0]                                   # [H, tq, dh]
    kt = kt_ref[0]                                 # [H, dh, tk]
    v = v_ref[0]                                   # [H, tk, dh]

    # Per-head scores for this KV chunk. NOTE: the reference applies NO
    # 1/sqrt(dh) scaling and NO mask (mask=False).  f32 accumulation on MXU.
    s = jnp.einsum('hqd,hdk->hqk', q, kt,
                   preferred_element_type=jnp.float32)        # [H, tq, tk]

    # Online (streaming) softmax update.
    m_prev = m_sc[...]
    m_new = jnp.maximum(m_prev, jnp.max(s, axis=-1, keepdims=True))
    corr = jnp.exp(m_prev - m_new)                            # rescale factor
    p = jnp.exp(s - m_new)                                    # [H, tq, tk] f32
    l_sc[...] = corr * l_sc[...] + jnp.sum(p, axis=-1, keepdims=True)
    acc_sc[...] = corr * acc_sc[...] + jnp.einsum(
        'hqk,hkd->hqd', p.astype(v.dtype), v,
        preferred_element_type=jnp.float32)                   # [H, tq, dh]
    m_sc[...] = m_new

    @pl.when(kv_step == pl.num_programs(2) - 1)
    def _finalize():
        inv_l = pl.reciprocal(l_sc[...], approx=approx_recip)
        ctx = (acc_sc[...] * inv_l).astype(wo_ref.dtype)      # [H, tq, dh]
        # Fused head-merge + output projection:
        #   merged @ Wo == sum_h ctx_h @ Wo[h*dh:(h+1)*dh, :]
        per_head = jnp.einsum('hqd,hdf->hqf', ctx, wo_ref[...],
                              preferred_element_type=jnp.float32)  # [H, tq, E]
        out = jnp.sum(per_head, axis=0) + bo_ref[...]         # [tq, E] f32
        out = jnp.maximum(out, 0.0)                           # ReLU
        o_ref[0] = out.astype(o_ref.dtype)


def multi_head_enc_dec_attention(q, encoder_k, encoder_v, params, num_header,
                                 *, compute_dtype=jnp.float32,
                                 q_block=None, kv_block=None):
    """q:[N,T1,E], encoder_k/v:[N,T2,E] float32. Returns [N,T1,E] float32."""
    N, T1, E = q.shape
    _, T2, _ = encoder_k.shape
    assert E % num_header == 0
    H = num_header
    dh = E // H

    tq = T1 if q_block is None else min(q_block, T1)
    tk = T2 if kv_block is None else min(kv_block, T2)
    assert T1 % tq == 0 and T2 % tk == 0
    # (8,128) tiling constraints on block shapes:
    assert tq == T1 or tq % 8 == 0, "q tile must be a multiple of 8 (sublane)"
    assert tk == T2 or tk % 128 == 0, "kv chunk must be a multiple of 128 (lane)"

    # Wrapper-side layout plumbing (plain XLA, outside the kernel):
    #   head split, and K pre-transposed so its lane dim is T2 (not dh).
    qh = q.reshape(N, T1, H, dh).transpose(0, 2, 1, 3)            # [N,H,T1,dh]
    kth = encoder_k.reshape(N, T2, H, dh).transpose(0, 2, 3, 1)   # [N,H,dh,T2]
    vh = encoder_v.reshape(N, T2, H, dh).transpose(0, 2, 1, 3)    # [N,H,T2,dh]
    woh = params["wo"].reshape(H, dh, E)                          # [H,dh,E]
    bo = params["bo"].astype(jnp.float32)                         # [1,E]

    # bf16 storage happens HERE (halves DMA + VMEM); kernel keeps f32 accum.
    if compute_dtype != jnp.float32:
        qh = qh.astype(compute_dtype)
        kth = kth.astype(compute_dtype)
        vh = vh.astype(compute_dtype)
        woh = woh.astype(compute_dtype)

    grid = (N, T1 // tq, T2 // tk)

    q_spec = pl.BlockSpec((1, H, tq, dh), lambda n, i, j: (n, 0, i, 0))
    kt_spec = pl.BlockSpec((1, H, dh, tk), lambda n, i, j: (n, 0, 0, j))
    v_spec = pl.BlockSpec((1, H, tk, dh), lambda n, i, j: (n, 0, j, 0))
    wo_spec = pl.BlockSpec((H, dh, E), lambda n, i, j: (0, 0, 0))   # resident
    bo_spec = pl.BlockSpec((1, E), lambda n, i, j: (0, 0))          # resident
    out_spec = pl.BlockSpec((1, tq, E), lambda n, i, j: (n, i, 0))  # resident over j

    scratch = [
        pltpu.VMEM((H, tq, 1), jnp.float32),    # m (running max)
        pltpu.VMEM((H, tq, 1), jnp.float32),    # l (running denom)
        pltpu.VMEM((H, tq, dh), jnp.float32),   # acc (running context)
    ]

    # Explicit VMEM budget (v5e scoped default is 16 MiB). Rough estimate:
    # double-buffered blocks + scratch, with headroom; clamp to [32, 64] MiB.
    itemsize = jnp.dtype(compute_dtype).itemsize
    est = 2 * itemsize * (H * tq * dh + H * dh * tk + H * tk * dh + H * dh * E)
    est += 2 * 4 * (E + tq * E)                       # bias + f32 output block
    est += 4 * (H * tq * (2 + dh))                    # scratch
    vmem_limit = int(min(max(4 * est, 32 * 1024 * 1024), 64 * 1024 * 1024))

    kernel = functools.partial(mheda_kernel,
                               approx_recip=(compute_dtype != jnp.float32))

    return pl.pallas_call(
        kernel,
        out_shape=jax.ShapeDtypeStruct((N, T1, E), q.dtype),
        grid_spec=pltpu.PrefetchScalarGridSpec(
            num_scalar_prefetch=0,
            grid=grid,
            in_specs=[q_spec, kt_spec, v_spec, wo_spec, bo_spec],
            out_specs=out_spec,
            scratch_shapes=scratch,
        ),
        compiler_params=pltpu.CompilerParams(
            dimension_semantics=("parallel", "parallel", "arbitrary"),
            vmem_limit_bytes=vmem_limit,
        ),
    )(qh, kth, vh, woh, bo)


def reference_forward(q, encoder_k, encoder_v, params, num_header):
    """Pure-JAX reference mirroring the PyTorch module semantics."""
    N, T1, E = q.shape
    dh = E // num_header

    def split(t):
        n, tt, e = t.shape
        return t.reshape(n, tt, num_header, dh).transpose(0, 2, 1, 3)

    qs, ks, vs = split(q), split(encoder_k), split(encoder_v)
    scores = qs @ jnp.swapaxes(ks, -2, -1)            # no scale, no mask
    alpha = jax.nn.softmax(scores, axis=-1)
    o = alpha @ vs                                    # [N, H, T1, dh]
    o = o.transpose(0, 2, 1, 3).reshape(N, T1, E)
    o = o @ params["wo"] + params["bo"]               # Wo stored [in, out]
    return jnp.maximum(o, 0.0)


def make_params(key, hidden_size):
    """nn.Linear-style init: uniform(-1/sqrt(fan_in), 1/sqrt(fan_in))."""
    bound = 1.0 / (hidden_size ** 0.5)
    kw, kb = jax.random.split(key)
    wo = jax.random.uniform(kw, (hidden_size, hidden_size), dtype=jnp.float32,
                            minval=-bound, maxval=bound)          # [in, out]
    bo = jax.random.uniform(kb, (1, hidden_size), dtype=jnp.float32,
                            minval=-bound, maxval=bound)
    return {"wo": wo, "bo": bo}


if __name__ == "__main__":
    # batch, decoder seq, encoder seq, hidden, heads
    N, T1, T2, E, H = 2, 16, 256, 32, 4

    key = jax.random.PRNGKey(0)
    kq, kk, kv, kp = jax.random.split(key, 4)
    q = jax.random.normal(kq, (N, T1, E), dtype=jnp.float32)
    enc_k = jax.random.normal(kk, (N, T2, E), dtype=jnp.float32)
    enc_v = jax.random.normal(kv, (N, T2, E), dtype=jnp.float32)
    params = make_params(kp, E)

    ref = reference_forward(q, enc_k, enc_v, params, H)

    # f32, single tile per batch element (whole T1 / T2 per grid step).
    out_f32 = jax.block_until_ready(
        multi_head_enc_dec_attention(q, enc_k, enc_v, params, H))
    assert out_f32.shape == (N, T1, E)
    assert jnp.allclose(out_f32, ref, atol=5e-5, rtol=5e-5), \
        "f32 (untiled) mismatch vs reference"

    # f32, tiled: exercises T1 tiling + KV-chunked online softmax (grid 2x2x2).
    out_f32_tiled = jax.block_until_ready(
        multi_head_enc_dec_attention(q, enc_k, enc_v, params, H,
                                     q_block=8, kv_block=128))
    assert jnp.allclose(out_f32_tiled, ref, atol=5e-5, rtol=5e-5), \
        "f32 (tiled) mismatch vs reference"

    # bf16 storage / MXU path with f32 accumulation (looser tolerance by
    # construction: the module uses UNSCALED logits, which amplifies rounding).
    out_bf16 = jax.block_until_ready(
        multi_head_enc_dec_attention(q, enc_k, enc_v, params, H,
                                     compute_dtype=jnp.bfloat16,
                                     q_block=8, kv_block=128))
    assert jnp.allclose(out_bf16, ref, atol=7.5e-2, rtol=7.5e-2), \
        "bf16 mismatch vs reference"

    print("KERNEL_OK")
</pallas_src>

<mosaic_0001>
module attributes {stable_mosaic.version = 11 : i64} {
  func.func @mheda_kernel(%arg0: i32, %arg1: i32, %arg2: i32, %arg3: memref<1x4x16x8xf32, #tpu.memory_space<vmem>>, %arg4: memref<1x4x8x256xf32, #tpu.memory_space<vmem>>, %arg5: memref<1x4x256x8xf32, #tpu.memory_space<vmem>>, %arg6: memref<4x8x32xf32, #tpu.memory_space<vmem>>, %arg7: memref<1x32xf32, #tpu.memory_space<vmem>>, %arg8: memref<1x16x32xf32, #tpu.memory_space<vmem>>, %arg9: memref<4x16x1xf32, #tpu.memory_space<vmem>>, %arg10: memref<4x16x1xf32, #tpu.memory_space<vmem>>, %arg11: memref<4x16x8xf32, #tpu.memory_space<vmem>>) attributes {dimension_semantics = [#tpu.dimension_semantics<parallel>, #tpu.dimension_semantics<parallel>, #tpu.dimension_semantics<arbitrary>], iteration_bounds = array<i64: 2, 1, 1>, scalar_prefetch = 0 : i64, scratch_operands = 3 : i64, tpu.core_type = #tpu.core_type<tc>, window_params = [{transform_indices = @transform_0, window_bounds = array<i64: 1, 4, 16, 8>}, {transform_indices = @transform_1, window_bounds = array<i64: 1, 4, 8, 256>}, {transform_indices = @transform_2, window_bounds = array<i64: 1, 4, 256, 8>}, {pipeline_mode = #tpu.pipeline_mode<synchronous>, transform_indices = @transform_3, window_bounds = array<i64: 4, 8, 32>}, {pipeline_mode = #tpu.pipeline_mode<synchronous>, transform_indices = @transform_4, window_bounds = array<i64: 1, 32>}, {transform_indices = @transform_5, window_bounds = array<i64: 1, 16, 32>}]} {
    %c0_i32 = arith.constant 0 : i32
    %0 = arith.cmpi eq, %arg2, %c0_i32 : i32
    %1 = arith.extui %0 : i1 to i32
    %c0_i32_0 = arith.constant 0 : i32
    %2 = arith.cmpi ne, %1, %c0_i32_0 : i32
    scf.if %2 {
      %cst_35 = arith.constant 0xFF800000 : f32
      %35 = vector.broadcast %cst_35 : f32 to vector<4x16x1xf32>
      %c0_36 = arith.constant 0 : index
      %c0_37 = arith.constant 0 : index
      %c0_38 = arith.constant 0 : index
      %36 = vector.load %arg9[%c0_36, %c0_37, %c0_38] : memref<4x16x1xf32, #tpu.memory_space<vmem>>, vector<4x16x1xf32>
      tpu.vector_store %arg9[%c0_36, %c0_37, %c0_38], %35 {strides = array<i32>} : memref<4x16x1xf32, #tpu.memory_space<vmem>>, vector<4x16x1xf32>,
      %cst_39 = arith.constant 0.000000e+00 : f32
      %37 = vector.broadcast %cst_39 : f32 to vector<4x16x1xf32>
      %c0_40 = arith.constant 0 : index
      %c0_41 = arith.constant 0 : index
      %c0_42 = arith.constant 0 : index
      %38 = vector.load %arg10[%c0_40, %c0_41, %c0_42] : memref<4x16x1xf32, #tpu.memory_space<vmem>>, vector<4x16x1xf32>
      tpu.vector_store %arg10[%c0_40, %c0_41, %c0_42], %37 {strides = array<i32>} : memref<4x16x1xf32, #tpu.memory_space<vmem>>, vector<4x16x1xf32>,
      %cst_43 = arith.constant 0.000000e+00 : f32
      %39 = vector.broadcast %cst_43 : f32 to vector<4x16x8xf32>
      %c0_44 = arith.constant 0 : index
      %c0_45 = arith.constant 0 : index
      %c0_46 = arith.constant 0 : index
      %40 = vector.load %arg11[%c0_44, %c0_45, %c0_46] : memref<4x16x8xf32, #tpu.memory_space<vmem>>, vector<4x16x8xf32>
      tpu.vector_store %arg11[%c0_44, %c0_45, %c0_46], %39 {strides = array<i32>} : memref<4x16x8xf32, #tpu.memory_space<vmem>>, vector<4x16x8xf32>,
    } else {
    }
    %c0 = arith.constant 0 : index
    %c0_1 = arith.constant 0 : index
    %c0_2 = arith.constant 0 : index
    %c0_3 = arith.constant 0 : index
    %3 = vector.load %arg3[%c0, %c0_1, %c0_2, %c0_3] : memref<1x4x16x8xf32, #tpu.memory_space<vmem>>, vector<1x4x16x8xf32>
    %4 = vector.shape_cast %3 : vector<1x4x16x8xf32> to vector<4x16x8xf32>
    %c0_4 = arith.constant 0 : index
    %c0_5 = arith.constant 0 : index
    %c0_6 = arith.constant 0 : index
    %c0_7 = arith.constant 0 : index
    %5 = vector.load %arg4[%c0_4, %c0_5, %c0_6, %c0_7] : memref<1x4x8x256xf32, #tpu.memory_space<vmem>>, vector<1x4x8x256xf32>
    %6 = vector.shape_cast %5 : vector<1x4x8x256xf32> to vector<4x8x256xf32>
    %c0_8 = arith.constant 0 : index
    %c0_9 = arith.constant 0 : index
    %c0_10 = arith.constant 0 : index
    %c0_11 = arith.constant 0 : index
    %7 = vector.load %arg5[%c0_8, %c0_9, %c0_10, %c0_11] : memref<1x4x256x8xf32, #tpu.memory_space<vmem>>, vector<1x4x256x8xf32>
    %8 = vector.shape_cast %7 : vector<1x4x256x8xf32> to vector<4x256x8xf32>
    "tpu.trace_start"() <{level = 10 : i32, message = "hqd,hdk->hqk"}> : () -> ()
    %cst = arith.constant dense<0.000000e+00> : vector<4x16x256xf32>
    %9 = tpu.matmul %4, %6, %cst {dimension_numbers = #tpu.dot_dimension_numbers<[2], [1], [1], [2], [0, 0, 0, 1, 1, 2], [0], [0]>} : vector<4x16x8xf32>, vector<4x8x256xf32>, vector<4x16x256xf32> -> vector<4x16x256xf32>
    "tpu.trace_stop"() : () -> ()
    %c0_12 = arith.constant 0 : index
    %c0_13 = arith.constant 0 : index
    %c0_14 = arith.constant 0 : index
    %10 = vector.load %arg9[%c0_12, %c0_13, %c0_14] : memref<4x16x1xf32, #tpu.memory_space<vmem>>, vector<4x16x1xf32>
    %cst_15 = arith.constant dense<0xFF800000> : vector<4x16xf32>
    %11 = vector.multi_reduction <maximumf>, %9, %cst_15 [2] : vector<4x16x256xf32> to vector<4x16xf32>
    %12 = vector.shape_cast %11 : vector<4x16xf32> to vector<4x16x1xf32>
    %13 = arith.maximumf %10, %12 : vector<4x16x1xf32>
    %14 = arith.subf %10, %13 : vector<4x16x1xf32>
    %15 = math.exp %14 : vector<4x16x1xf32>
    %16 = vector.broadcast %13 : vector<4x16x1xf32> to vector<4x16x256xf32>
    %17 = arith.subf %9, %16 : vector<4x16x256xf32>
    %18 = math.exp %17 : vector<4x16x256xf32>
    %c0_16 = arith.constant 0 : index
    %c0_17 = arith.constant 0 : index
    %c0_18 = arith.constant 0 : index
    %19 = vector.load %arg10[%c0_16, %c0_17, %c0_18] : memref<4x16x1xf32, #tpu.memory_space<vmem>>, vector<4x16x1xf32>
    %20 = arith.mulf %15, %19 : vector<4x16x1xf32>
    %cst_19 = arith.constant dense<0.000000e+00> : vector<4x16xf32>
    %21 = vector.multi_reduction <add>, %18, %cst_19 [2] : vector<4x16x256xf32> to vector<4x16xf32>
    %22 = vector.shape_cast %21 : vector<4x16xf32> to vector<4x16x1xf32>
    %23 = arith.addf %20, %22 : vector<4x16x1xf32>
    %c0_20 = arith.constant 0 : index
    %c0_21 = arith.constant 0 : index
    %c0_22 = arith.constant 0 : index
    %24 = vector.load %arg10[%c0_20, %c0_21, %c0_22] : memref<4x16x1xf32, #tpu.memory_space<vmem>>, vector<4x16x1xf32>
    tpu.vector_store %arg10[%c0_20, %c0_21, %c0_22], %23 {strides = array<i32>} : memref<4x16x1xf32, #tpu.memory_space<vmem>>, vector<4x16x1xf32>,
    %c0_23 = arith.constant 0 : index
    %c0_24 = arith.constant 0 : index
    %c0_25 = arith.constant 0 : index
    %25 = vector.load %arg11[%c0_23, %c0_24, %c0_25] : memref<4x16x8xf32, #tpu.memory_space<vmem>>, vector<4x16x8xf32>
    %26 = vector.broadcast %15 : vector<4x16x1xf32> to vector<4x16x8xf32>
    %27 = arith.mulf %26, %25 : vector<4x16x8xf32>
    "tpu.trace_start"() <{level = 10 : i32, message = "hqk,hkd->hqd"}> : () -> ()
    %cst_26 = arith.constant dense<0.000000e+00> : vector<4x16x8xf32>
    %28 = tpu.matmul %18, %8, %cst_26 {dimension_numbers = #tpu.dot_dimension_numbers<[2], [1], [1], [2], [0, 0, 0, 1, 1, 2], [0], [0]>} : vector<4x16x256xf32>, vector<4x256x8xf32>, vector<4x16x8xf32> -> vector<4x16x8xf32>
    "tpu.trace_stop"() : () -> ()
    %29 = arith.addf %27, %28 : vector<4x16x8xf32>
    %c0_27 = arith.constant 0 : index
    %c0_28 = arith.constant 0 : index
    %c0_29 = arith.constant 0 : index
    %30 = vector.load %arg11[%c0_27, %c0_28, %c0_29] : memref<4x16x8xf32, #tpu.memory_space<vmem>>, vector<4x16x8xf32>
    tpu.vector_store %arg11[%c0_27, %c0_28, %c0_29], %29 {strides = array<i32>} : memref<4x16x8xf32, #tpu.memory_space<vmem>>, vector<4x16x8xf32>,
    %c0_30 = arith.constant 0 : index
    %c0_31 = arith.constant 0 : index
    %c0_32 = arith.constant 0 : index
    %31 = vector.load %arg9[%c0_30, %c0_31, %c0_32] : memref<4x16x1xf32, #tpu.memory_space<vmem>>, vector<4x16x1xf32>
    tpu.vector_store %arg9[%c0_30, %c0_31, %c0_32], %13 {strides = array<i32>} : memref<4x16x1xf32, #tpu.memory_space<vmem>>, vector<4x16x1xf32>,
    %c0_i32_33 = arith.constant 0 : i32
    %32 = arith.cmpi eq, %arg2, %c0_i32_33 : i32
    %33 = arith.extui %32 : i1 to i32
    %c0_i32_34 = arith.constant 0 : i32
    %34 = arith.cmpi ne, %33, %c0_i32_34 : i32
    scf.if %34 {
      %c0_35 = arith.constant 0 : index
      %c0_36 = arith.constant 0 : index
      %c0_37 = arith.constant 0 : index
      %35 = vector.load %arg10[%c0_35, %c0_36, %c0_37] : memref<4x16x1xf32, #tpu.memory_space<vmem>>, vector<4x16x1xf32>
      %36 = tpu.reciprocal %35 : vector<4x16x1xf32> -> vector<4x16x1xf32>
      %c0_38 = arith.constant 0 : index
      %c0_39 = arith.constant 0 : index
      %c0_40 = arith.constant 0 : index
      %37 = vector.load %arg11[%c0_38, %c0_39, %c0_40] : memref<4x16x8xf32, #tpu.memory_space<vmem>>, vector<4x16x8xf32>
      %38 = vector.broadcast %36 : vector<4x16x1xf32> to vector<4x16x8xf32>
      %39 = arith.mulf %37, %38 : vector<4x16x8xf32>
      %c0_41 = arith.constant 0 : index
      %c0_42 = arith.constant 0 : index
      %c0_43 = arith.constant 0 : index
      %40 = vector.load %arg6[%c0_41, %c0_42, %c0_43] : memref<4x8x32xf32, #tpu.memory_space<vmem>>, vector<4x8x32xf32>
      "tpu.trace_start"() <{level = 10 : i32, message = "hqd,hdf->hqf"}> : () -> ()
      %cst_44 = arith.constant dense<0.000000e+00> : vector<4x16x32xf32>
      %41 = tpu.matmul %39, %40, %cst_44 {dimension_numbers = #tpu.dot_dimension_numbers<[2], [1], [1], [2], [0, 0, 0, 1, 1, 2], [0], [0]>} : vector<4x16x8xf32>, vector<4x8x32xf32>, vector<4x16x32xf32> -> vector<4x16x32xf32>
      "tpu.trace_stop"() : () -> ()
      %cst_45 = arith.constant dense<0.000000e+00> : vector<16x32xf32>
      %42 = vector.multi_reduction <add>, %41, %cst_45 [0] : vector<4x16x32xf32> to vector<16x32xf32>
      %c0_46 = arith.constant 0 : index
      %c0_47 = arith.constant 0 : index
      %43 = vector.load %arg7[%c0_46, %c0_47] : memref<1x32xf32, #tpu.memory_space<vmem>>, vector<1x32xf32>
      %44 = vector.broadcast %43 : vector<1x32xf32> to vector<16x32xf32>
      %45 = arith.addf %42, %44 : vector<16x32xf32>
      %cst_48 = arith.constant 0.000000e+00 : f32
      %46 = vector.broadcast %cst_48 : f32 to vector<16x32xf32>
      %47 = arith.maximumf %45, %46 : vector<16x32xf32>
      %c0_49 = arith.constant 0 : index
      %c0_50 = arith.constant 0 : index
      %c0_51 = arith.constant 0 : index
      %48 = vector.load %arg8[%c0_49, %c0_50, %c0_51] : memref<1x16x32xf32, #tpu.memory_space<vmem>>, vector<1x16x32xf32>
      %49 = vector.shape_cast %48 : vector<1x16x32xf32> to vector<16x32xf32>
      %50 = vector.shape_cast %47 : vector<16x32xf32> to vector<1x16x32xf32>
      tpu.vector_store %arg8[%c0_49, %c0_50, %c0_51], %50 {strides = array<i32>} : memref<1x16x32xf32, #tpu.memory_space<vmem>>, vector<1x16x32xf32>,
    } else {
    }
    return
  }
  func.func @transform_0(%arg0: i32, %arg1: i32, %arg2: i32) -> (i32, i32, i32, i32) {
    %c0_i32 = arith.constant 0 : i32
    %c0_i32_0 = arith.constant 0 : i32
    %c0_i32_1 = arith.constant 0 : i32
    return %arg0, %c0_i32, %arg1, %c0_i32_0 : i32, i32, i32, i32
  }
  func.func @transform_1(%arg0: i32, %arg1: i32, %arg2: i32) -> (i32, i32, i32, i32) {
    %c0_i32 = arith.constant 0 : i32
    %c0_i32_0 = arith.constant 0 : i32
    %c0_i32_1 = arith.constant 0 : i32
    return %arg0, %c0_i32, %c0_i32_0, %arg2 : i32, i32, i32, i32
  }
  func.func @transform_2(%arg0: i32, %arg1: i32, %arg2: i32) -> (i32, i32, i32, i32) {
    %c0_i32 = arith.constant 0 : i32
    %c0_i32_0 = arith.constant 0 : i32
    %c0_i32_1 = arith.constant 0 : i32
    return %arg0, %c0_i32, %arg2, %c0_i32_0 : i32, i32, i32, i32
  }
  func.func @transform_3(%arg0: i32, %arg1: i32, %arg2: i32) -> (i32, i32, i32) {
    %c0_i32 = arith.constant 0 : i32
    %c0_i32_0 = arith.constant 0 : i32
    %c0_i32_1 = arith.constant 0 : i32
    %c0_i32_2 = arith.constant 0 : i32
    return %c0_i32, %c0_i32_0, %c0_i32_1 : i32, i32, i32
  }
  func.func @transform_4(%arg0: i32, %arg1: i32, %arg2: i32) -> (i32, i32) {
    %c0_i32 = arith.constant 0 : i32
    %c0_i32_0 = arith.constant 0 : i32
    %c0_i32_1 = arith.constant 0 : i32
    return %c0_i32, %c0_i32_0 : i32, i32
  }
  func.func @transform_5(%arg0: i32, %arg1: i32, %arg2: i32) -> (i32, i32, i32) {
    %c0_i32 = arith.constant 0 : i32
    %c0_i32_0 = arith.constant 0 : i32
    return %arg0, %arg1, %c0_i32 : i32, i32, i32
  }
}

</mosaic_0001>

<bundles_post_ra>
// kernel: tpu_custom_call.1
= control target key start
LH: loop header
LB: loop body
LE: loop exit
PB: predicated region body
PF: predicated region fallthrough
CT: control target
= control target key end

     0   :  { %10 = vsyncpa [#allocation6], 0  ;;  %s3017_s0 = inlined_call_operand.vmem [shape: f32[2,4,16,8], index: 0, kind: input, shape index: {}]   ;;  %s3018_s1 = inlined_call_operand.vmem [shape: f32[2,4,8,256], index: 1, kind: input, shape index: {}]   ;;  %s3019_s2 = inlined_call_operand.vmem [shape: f32[2,4,256,8], index: 2, kind: input, shape index: {}]   ;;  %s3020_s3 = inlined_call_operand.vmem [shape: f32[4,8,32], index: 3, kind: input, shape index: {}]   ;;  %s3021_s4 = inlined_call_operand.vmem [shape: f32[1,32], index: 4, kind: input, shape index: {}]   ;;  %s3022_s5 = inlined_call_operand.hbm [shape: f32[2,16,32], index: 5, kind: output, shape index: {}]  }
   0x1   :  { %12 = vsyncpa [#allocation6 + $0x1], 0  ;;  %s2456_s18 = smov 0   ;;  %s2458_s19 = smov 0  }
   0x2   :  { %s2460_s20 = smov 0   ;;  %s2462_s21 = smov 0  }
   0x3   :  { %s2464_s22 = smov 0   ;;  %s2466_s23 = smov 0  }
   0x4 LB: > { %s1994_s24 = sadd.s32 4294967295, %s2418_s23   ;;  %s1995_s25 = sadd.s32 4294967294, %s2418_s23   ;;  %s2418_s23 = sphi %s2466_s23, %s18_s23   ;;  %s2414_s22 = sphi %s2464_s22, %s3029_s22   ;;  %s2410_s21 = sphi %s2462_s21, %s3028_s21   ;;  %s2406_s20 = sphi %s2460_s20, %s3027_s20   ;;  %s2402_s19 = sphi %s2458_s19, %s3026_s19   ;;  %s2398_s18 = sphi %s2456_s18, %s3025_s18  }
   0x5   : > { %s37_s26 = sadd.s32 1, %s2414_s22  ;;  %s172_s27 = sadd.s32 1, %s2406_s20 }
   0x6   : > { %p39_p0 = scmp.ge.s32.totalorder %s37_s26, 2  ;;  %p182_p1 = scmp.ne.s32.totalorder %s2406_s20, %s2402_s19 }
   0x7   : > { %p183_p2 = scmp.eq.s32.totalorder %s1994_s24, 1  ;;  %p188_p3 = scmp.ne.s32.totalorder %s2402_s19, %s2398_s18 }
   0x8   : > { %s3031_s26 = smov (%p39_p0, %s37_s26), 0  ;;  %p189_p5 = scmp.eq.s32.totalorder %s1995_s25, 1 }
   0x9   : > { %p2496_p4 = por %p183_p2, %p182_p1  ;;  %s167_s29 = ssub.s32 %s2414_s22, %s3031_s26 }
   0xa   : > { %p1998_p6 = scmp.ge.s32.totalorder %s2418_s23, 1  ;;  %p170_p7 = scmp.eq.s32.totalorder %s167_s29, 0 }
   0xb   : > { %p2503_p8 = por %p189_p5, %p188_p3  ;;  %p252_p9 = scmp.lt.s32.totalorder %s2418_s23, 3 }
   0xc   : > { %s2509_s6 = scalar_select %p170_p7, %s2406_s20, %s172_s27  }
   0xd   : > { %p253_p10 = pnand %p1998_p6, %p252_p9 }
   0xe   : > { %p303_p11 = scmp.lt.s32.totalorder (!%p253_p10), %s2410_s21, 1  ;;  %s299_s12 = sand.u32 (!%p253_p10), 1, %s2402_s19  }
   0xf   : > { %256 = sbr.rel (%p253_p10) target bundleno = 1049 (0x419), region = 40  ;;  %s1999_s13 = sshll.u32 (!%p253_p10), %s299_s12, 4 }
  0x10   : > { %s2031_s16 = sshll.u32 (!%p253_p10), %s2410_s21, 8  ;;  %s301_s17 = scalar_lea.vmem (!%p253_p10), [#allocation5], %s1999_s13 }
  0x11   : > { %s2964_s29 = scalar_lea.hbm (!%p253_p10), %s3022_s5, %s2031_s16 }
  0x14   : > { %vm354_vm0 = vcmask 64512   ;;  %v2420_v0 = vmov 0.0   ;;  %s2531_s7 = scalar_select %p303_p11, %s2410_s21, 1  ;;  %vm337_vm1 = vcmask 7168   ;;  %v2421_v17 = vmov -inf  }
  0x15   : > { %578 = vmatprep.mubr.f32.mxu0 %v2420_v0  ;;  %355 = vst.msk [vmem:[#allocation4] sm:$0xff] %vm354_vm0, %v2420_v0  ;;  %356 = vst.msk [vmem:[#allocation4 + $0x8] sm:$0xff] %vm354_vm0, %v2420_v0  ;;  %661 = vmatprep.mubr.f32.mxu1 %v2420_v0  ;;  %v2422_v41 = vmov 0   ;;  %vm1832_vm2 = vcmask 261120   ;;  %s2972_s21 = scalar_lea.sflag [#allocation6], %s299_s12 }
  0x16   : > { %357 = vst.msk [vmem:[#allocation4 + $0x10] sm:$0xff] %vm354_vm0, %v2420_v0  ;;  %358 = vst.msk [vmem:[#allocation4 + $0x18] sm:$0xff] %vm354_vm0, %v2420_v0  ;;  %s2028_s8 = sshll.u32 %s2531_s7, 6  ;;  %2276 = vset.pattern.permute.xlu0 %v2422_v41  ;;  %2277 = vset.pattern.permute.xlu1 %v2422_v41  ;;  %s2030_s15 = sshll.u32 %s2531_s7, 10 }
  0x17   : > { %359 = vst.msk [vmem:[#allocation4 + $0x20] sm:$0xff] %vm354_vm0, %v2420_v0  ;;  %360 = vst.msk [vmem:[#allocation4 + $0x28] sm:$0xff] %vm354_vm0, %v2420_v0  ;;  %s2537_s11 = scalar_lea.vmem %s3017_s0, %s2028_s8  ;;  %s320_s14 = scalar_lea.vmem %s3018_s1, %s2028_s8 }
  0x18   : > { %361 = vst.msk [vmem:[#allocation4 + $0x30] sm:$0xff] %vm354_vm0, %v2420_v0  ;;  %362 = vst.msk [vmem:[#allocation4 + $0x38] sm:$0xff] %vm354_vm0, %v2420_v0  ;;  %v372_v1 = vld [vmem:[%s320_s14 + $0x8] sm:$0xff]  ;;  %v371_v2 = vld [vmem:[%s320_s14] sm:$0xff]  ;;  %s2640_s24 = scalar_lea.vmem %s3019_s2, %s2030_s15  ;;  %s2423_s8 = smov [#allocation5]  }
  0x19   : > { %v363_v3 = vld [vmem:[%s2537_s11] sm:$0xff]  ;;  %544 = vmatprep.subr.mxu0 %v372_v1  ;;  %v374_v4 = vld [vmem:[%s320_s14 + $0x18] sm:$0xff]  ;;  %v373_v5 = vld [vmem:[%s320_s14 + $0x10] sm:$0xff]  ;;  %338 = vst.msk [vmem:[#allocation2] sm:$0xff] %vm337_vm1, %v2421_v17  ;;  %s2346_s9 = sshll.u32 %s2423_s8, 4  ;;  %s2347_s9 = int_to_ptr.vmem [resolvable:$false] %s2346_s9 }
  0x1a   : > { %v365_v6 = vld [vmem:[%s2537_s11 + $0x10] sm:$0xff]  ;;  %545 = vmatpush1.msra.mxu0 %v371_v2  ;;  %627 = vmatprep.subr.mxu1 %v374_v4  ;;  %v376_v7 = vld [vmem:[%s320_s14 + $0x28] sm:$0xff]  ;;  %v375_v8 = vld [vmem:[%s320_s14 + $0x20] sm:$0xff]  ;;  %339 = vst.msk [vmem:[#allocation2 + $0x8] sm:$0xff] %vm337_vm1, %v2421_v17  ;;  %s2348_s10 = scalar_lea.vmem %s2347_s9, 512 }
  0x1b   : > { %2006 = vmatmul.mubr.msk.f32.vlgmr.msra.gmra.mxu0 %vm354_vm0, %v363_v3  ;;  %628 = vmatpush1.msra.mxu1 %v373_v5  ;;  %v378_v9 = vld [vmem:[%s320_s14 + $0x38] sm:$0xff]  ;;  %v364_v10 = vld [vmem:[%s2537_s11 + $0x8] sm:$0xff]  ;;  %v377_v11 = vld [vmem:[%s320_s14 + $0x30] sm:$0xff]  ;;  %340 = vst.msk [vmem:[#allocation2 + $0x10] sm:$0xff] %vm337_vm1, %v2421_v17 }
  0x1c   : > { %2008 = vmatmul.mubr.msk.f32.vlgmr.msra.gmra.mxu1 %vm354_vm0, %v365_v6  ;;  %584 = vmatprep.mubr.f32.mxu0 %v2420_v0  ;;  %v366_v12 = vld [vmem:[%s2537_s11 + $0x18] sm:$0xff]  ;;  %v367_v13 = vld [vmem:[%s2537_s11 + $0x20] sm:$0xff]  ;;  %v369_v14 = vld [vmem:[%s2537_s11 + $0x30] sm:$0xff]  ;;  %341 = vst.msk [vmem:[#allocation2 + $0x18] sm:$0xff] %vm337_vm1, %v2421_v17 }
  0x1d   : > { %710 = vmatprep.subr.mxu0 %v376_v7  ;;  %667 = vmatprep.mubr.f32.mxu1 %v2420_v0  ;;  %v368_v15 = vld [vmem:[%s2537_s11 + $0x28] sm:$0xff]  ;;  %v370_v16 = vld [vmem:[%s2537_s11 + $0x38] sm:$0xff]  ;;  %342 = vst.msk [vmem:[#allocation2 + $0x20] sm:$0xff] %vm337_vm1, %v2421_v17  ;;  %343 = vst.msk [vmem:[#allocation2 + $0x28] sm:$0xff] %vm337_vm1, %v2421_v17 }
  0x1e   : > { %711 = vmatpush1.msra.mxu0 %v375_v8  ;;  %793 = vmatprep.subr.mxu1 %v378_v9  ;;  %344 = vst.msk [vmem:[#allocation2 + $0x30] sm:$0xff] %vm337_vm1, %v2421_v17  ;;  %345 = vst.msk [vmem:[#allocation2 + $0x38] sm:$0xff] %vm337_vm1, %v2421_v17  ;;  %v410_v43 = vld [vmem:[%s2640_s24 + $0xf8] sm:$0xff]  ;;  %v409_v45 = vld [vmem:[%s2640_s24 + $0xf0] sm:$0xff] }
  0x1f   : > { %2007 = vmatmul.mubr.msk.f32.gmra.mxu0 %vm354_vm0, %v364_v10  ;;  %794 = vmatpush1.msra.mxu1 %v377_v11  ;;  %346 = vst.msk [vmem:[#allocation3] sm:$0xff] %vm337_vm1, %v2420_v0  ;;  %347 = vst.msk [vmem:[#allocation3 + $0x8] sm:$0xff] %vm337_vm1, %v2420_v0  ;;  %v394_v44 = vld [vmem:[%s2640_s24 + $0x78] sm:$0xff]  ;;  %v393_v46 = vld [vmem:[%s2640_s24 + $0x70] sm:$0xff] }
  0x20   : > { %2009 = vmatmul.mubr.msk.f32.gmra.mxu1 %vm354_vm0, %v366_v12  ;;  %744 = vmatprep.mubr.f32.mxu0 %v2420_v0  ;;  %348 = vst.msk [vmem:[#allocation3 + $0x10] sm:$0xff] %vm337_vm1, %v2420_v0  ;;  %349 = vst.msk [vmem:[#allocation3 + $0x18] sm:$0xff] %vm337_vm1, %v2420_v0  ;;  %v442_v47 = vld [vmem:[%s2640_s24 + $0x1f8] sm:$0xff]  ;;  %v408_v48 = vld [vmem:[%s2640_s24 + $0xe8] sm:$0xff] }
  0x21   : > { %827 = vmatprep.mubr.f32.mxu1 %v2420_v0  ;;  %350 = vst.msk [vmem:[#allocation3 + $0x20] sm:$0xff] %vm337_vm1, %v2420_v0  ;;  %351 = vst.msk [vmem:[#allocation3 + $0x28] sm:$0xff] %vm337_vm1, %v2420_v0  ;;  %2032 = vmatprep.subr.mxu0 %v410_v43  ;;  %v426_v49 = vld [vmem:[%s2640_s24 + $0x178] sm:$0xff]  ;;  %v392_v50 = vld [vmem:[%s2640_s24 + $0x68] sm:$0xff] }
  0x22   : > { %352 = vst.msk [vmem:[#allocation3 + $0x30] sm:$0xff] %vm337_vm1, %v2420_v0  ;;  %353 = vst.msk [vmem:[#allocation3 + $0x38] sm:$0xff] %vm337_vm1, %v2420_v0  ;;  %2070 = vmatprep.subr.mxu1 %v442_v47  ;;  %v441_v51 = vld [vmem:[%s2640_s24 + $0x1f0] sm:$0xff]  ;;  %v407_v53 = vld [vmem:[%s2640_s24 + $0xe0] sm:$0xff] }
  0x23   : > { %2010 = vmatmul.mubr.msk.f32.vlgmr.msra.gmra.mxu0 %vm354_vm0, %v367_v13  ;;  %v425_v52 = vld [vmem:[%s2640_s24 + $0x170] sm:$0xff]  ;;  %v440_v54 = vld [vmem:[%s2640_s24 + $0x1e8] sm:$0xff]  ;;  %v391_v55 = vld [vmem:[%s2640_s24 + $0x60] sm:$0xff] }
  0x24   : > { %2012 = vmatmul.mubr.msk.f32.vlgmr.msra.gmra.mxu1 %vm354_vm0, %v369_v14  ;;  %750 = vmatprep.mubr.f32.mxu0 %v2420_v0  ;;  %v424_v56 = vld [vmem:[%s2640_s24 + $0x168] sm:$0xff]  ;;  %v439_v57 = vld [vmem:[%s2640_s24 + $0x1e0] sm:$0xff]  ;;  %v406_v58 = vld [vmem:[%s2640_s24 + $0xd8] sm:$0xff] }
  0x25   : > { %833 = vmatprep.mubr.f32.mxu1 %v2420_v0  ;;  %2033 = vmatpush3.msra.mxu0 %v394_v44  ;;  %v423_v59 = vld [vmem:[%s2640_s24 + $0x160] sm:$0xff]  ;;  %v390_v60 = vld [vmem:[%s2640_s24 + $0x58] sm:$0xff]  ;;  %v405_v62 = vld [vmem:[%s2640_s24 + $0xd0] sm:$0xff] }
  0x26   : > { %2034 = vmatprep.subr.mxu0 %v409_v45  ;;  %2071 = vmatpush3.msra.mxu1 %v426_v49  ;;  %v438_v61 = vld [vmem:[%s2640_s24 + $0x1d8] sm:$0xff]  ;;  %v389_v0 = vld [vmem:[%s2640_s24 + $0x50] sm:$0xff]  ;;  %v404_v1 = vld [vmem:[%s2640_s24 + $0xc8] sm:$0xff] }
  0x27   : > { %2011 = vmatmul.mubr.msk.f32.gmra.mxu0 %vm354_vm0, %v368_v15  ;;  %2072 = vmatprep.subr.mxu1 %v441_v51  ;;  %v422_v63 = vld [vmem:[%s2640_s24 + $0x158] sm:$0xff]  ;;  %v388_v2 = vld [vmem:[%s2640_s24 + $0x48] sm:$0xff]  ;;  %v2666_v3 = vld [vmem:[#allocation2] sm:$0xff] }
  0x28   : > { %2013 = vmatmul.mubr.msk.f32.gmra.mxu1 %vm354_vm0, %v370_v16  ;;  %2035 = vmatpush3.msra.mxu0 %v393_v46  ;;  %v403_v4 = vld [vmem:[%s2640_s24 + $0xc0] sm:$0xff]  ;;  %v437_v5 = vld [vmem:[%s2640_s24 + $0x1d0] sm:$0xff]  ;;  %v402_v11 = vld [vmem:[%s2640_s24 + $0xb8] sm:$0xff] }
  0x29   : > { %2036 = vmatprep.subr.mxu0 %v408_v48  ;;  %2073 = vmatpush3.msra.mxu1 %v425_v52  ;;  %v387_v7 = vld [vmem:[%s2640_s24 + $0x40] sm:$0xff]  ;;  %v421_v8 = vld [vmem:[%s2640_s24 + $0x150] sm:$0xff]  ;;  %v436_v12 = vld [vmem:[%s2640_s24 + $0x1c8] sm:$0xff] }
  0x2a   : > { %2037 = vmatpush3.msra.mxu0 %v392_v50  ;;  %2074 = vmatprep.subr.mxu1 %v440_v54  ;;  %v2675_v10 = vld [vmem:[#allocation2 + $0x10] sm:$0xff]  ;;  %v2679_v13 = vld [vmem:[#allocation2 + $0x8] sm:$0xff]  ;;  %v386_v14 = vld [vmem:[%s2640_s24 + $0x38] sm:$0xff] }
  0x2b   : > { %2038 = vmatprep.subr.mxu0 %v407_v53  ;;  %2075 = vmatpush3.msra.mxu1 %v424_v56  ;;  %v420_v15 = vld [vmem:[%s2640_s24 + $0x148] sm:$0xff]  ;;  %v401_v17 = vld [vmem:[%s2640_s24 + $0xb0] sm:$0xff]  ;;  %v2698_v41 = vld [vmem:[#allocation2 + $0x18] sm:$0xff] }
  0x2c   : > { %2039 = vmatpush3.msra.mxu0 %v391_v55  ;;  %2076 = vmatprep.subr.mxu1 %v439_v57  ;;  %v434_v43 = vld [vmem:[%s2640_s24 + $0x1b8] sm:$0xff]  ;;  %v2702_v44 = vld [vmem:[#allocation2 + $0x20] sm:$0xff]  ;;  %v384_v45 = vld [vmem:[%s2640_s24 + $0x28] sm:$0xff] }
  0x2d   : > { %2040 = vmatprep.subr.mxu0 %v406_v58  ;;  %2077 = vmatpush3.msra.mxu1 %v423_v59  ;;  %v418_v46 = vld [vmem:[%s2640_s24 + $0x138] sm:$0xff]  ;;  %v399_v49 = vld [vmem:[%s2640_s24 + $0xa0] sm:$0xff]  ;;  %v433_v50 = vld [vmem:[%s2640_s24 + $0x1b0] sm:$0xff] }
  0x2e   : > { %2041 = vmatpush3.msra.mxu0 %v390_v60  ;;  %2078 = vmatprep.subr.mxu1 %v438_v61  ;;  %v383_v53 = vld [vmem:[%s2640_s24 + $0x20] sm:$0xff]  ;;  %v417_v54 = vld [vmem:[%s2640_s24 + $0x130] sm:$0xff]  ;;  %v398_v58 = vld [vmem:[%s2640_s24 + $0x98] sm:$0xff] }
  0x2f   : > { %2042 = vmatprep.subr.mxu0 %v405_v62  ;;  %2079 = vmatpush3.msra.mxu1 %v422_v63  ;;  %v2725_v57 = vld [vmem:[#allocation2 + $0x30] sm:$0xff]  ;;  %v432_v59 = vld [vmem:[%s2640_s24 + $0x1a8] sm:$0xff]  ;;  %v382_v61 = vld [vmem:[%s2640_s24 + $0x18] sm:$0xff] }
  0x30   : > { %2043 = vmatpush3.msra.mxu0 %v389_v0  ;;  %2080 = vmatprep.subr.mxu1 %v437_v5  ;;  %v2729_v60 = vld [vmem:[#allocation2 + $0x28] sm:$0xff] }
  0x31   : > { %2044 = vmatprep.subr.mxu0 %v404_v1  ;;  %2081 = vmatpush3.msra.mxu1 %v421_v8  ;;  %v416_v62 = vld [vmem:[%s2640_s24 + $0x128] sm:$0xff]  ;;  %v397_v1 = vld [vmem:[%s2640_s24 + $0x90] sm:$0xff] }
  0x32   : > { %2045 = vmatpush3.msra.mxu0 %v388_v2  ;;  %2082 = vmatprep.subr.mxu1 %v436_v12  ;;  %v431_v2 = vld [vmem:[%s2640_s24 + $0x1a0] sm:$0xff]  ;;  %v396_v12 = vld [vmem:[%s2640_s24 + $0x88] sm:$0xff] }
  0x33   : > { %2046 = vmatprep.subr.mxu0 %v403_v4  ;;  %2083 = vmatpush3.msra.mxu1 %v420_v15  ;;  %v2754_v15 = vld [vmem:[#allocation2 + $0x38] sm:$0xff] }
  0x34   : > { %2047 = vmatpush3.msra.mxu0 %v387_v7  ;;  %v415_v7 = vld [vmem:[%s2640_s24 + $0x120] sm:$0xff] }
  0x35   : > { %2048 = vmatprep.subr.mxu0 %v402_v11 }
  0x36   : > { %2049 = vmatpush3.msra.mxu0 %v386_v14  ;;  %v430_v14 = vld [vmem:[%s2640_s24 + $0x198] sm:$0xff] }
  0x37   : > { %2050 = vmatprep.subr.mxu0 %v401_v17  ;;  %v380_v17 = vld [vmem:[%s2640_s24 + $0x8] sm:$0xff] }
  0xdb   : > { %v2588_v18 = vpop.f32.mrf.mxu0 }
  0xdc   : > { %v2590_v19 = vpop.f32.mrf.mxu1 }
  0xdd   : > { %v2592_v20 = vpop.f32.mrf.mxu0 }
  0xde   : > { %v2594_v21 = vpop.f32.mrf.mxu1  ;;  %v848_v22 = vmax.f32 %v2588_v18, %v2592_v20 }
  0xdf   : > { %v2598_v23 = vpop.f32.mrf.mxu0  ;;  %v854_v26 = vmax.f32 %v2590_v19, %v2594_v21 }
  0xe0   : > { %849 = vmax.xlane.f32.xlu0 %v848_v22  ;;  %v2600_v24 = vpop.f32.mrf.mxu1  ;;  %v435_v22 = vld [vmem:[%s2640_s24 + $0x1c0] sm:$0xff] }
  0xe1   : > { %v2602_v25 = vpop.f32.mrf.mxu0  ;;  %2084 = vmatprep.subr.mxu1 %v435_v22  ;;  %v414_v22 = vld [vmem:[%s2640_s24 + $0x118] sm:$0xff] }
  0xe2   : > { %v851_v27 = vmax.f32 %v2598_v23, %v2602_v25  ;;  %v2608_v28 = vpop.f32.mrf.mxu1 }
  0xe3   : > { %v2610_v29 = vpop.f32.mrf.mxu0  ;;  %v857_v30 = vmax.f32 %v2600_v24, %v2608_v28 }
  0xe4   : > { %855 = vmax.xlane.f32.xlu0 %v854_v26  ;;  %852 = vmax.xlane.f32.xlu1 %v851_v27  ;;  %v2614_v31 = vpop.f32.mrf.mxu1 }
  0xe5   : > { %v2616_v32 = vpop.f32.mrf.mxu0 }
  0xe6   : > { %v860_v33 = vmax.f32 %v2610_v29, %v2616_v32  ;;  %v2620_v34 = vpop.f32.mrf.mxu1 }
  0xe7   : > { %v2622_v35 = vpop.f32.mrf.mxu0  ;;  %v866_v36 = vmax.f32 %v2614_v31, %v2620_v34 }
  0xe8   : > { %858 = vmax.xlane.f32.xlu1 %v857_v30  ;;  %861 = vmax.xlane.f32.xlu0 %v860_v33  ;;  %v2626_v37 = vpop.f32.mrf.mxu1  ;;  %v385_v30 = vld [vmem:[%s2640_s24 + $0x30] sm:$0xff]  ;;  %v419_v33 = vld [vmem:[%s2640_s24 + $0x140] sm:$0xff] }
  0xe9   : > { %v2628_v38 = vpop.f32.mrf.mxu0  ;;  %2051 = vmatpush3.msra.mxu0 %v385_v30  ;;  %2085 = vmatpush3.msra.mxu1 %v419_v33  ;;  %v395_v30 = vld [vmem:[%s2640_s24 + $0x80] sm:$0xff]  ;;  %v429_v33 = vld [vmem:[%s2640_s24 + $0x190] sm:$0xff] }
  0xea   : > { %v863_v39 = vmax.f32 %v2622_v35, %v2628_v38  ;;  %v2632_v40 = vpop.f32.mrf.mxu1  ;;  %2086 = vmatprep.subr.mxu1 %v434_v43  ;;  %v379_v43 = vld [vmem:[%s2640_s24] sm:$0xff] }
  0xeb   : > { %v869_v42 = vmax.f32 %v2626_v37, %v2632_v40  ;;  %2087 = vmatpush3.msra.mxu1 %v418_v46  ;;  %v413_v46 = vld [vmem:[%s2640_s24 + $0x110] sm:$0xff] }
  0xec   : > { %867 = vmax.xlane.f32.xlu1 %v866_v36  ;;  %864 = vmax.xlane.f32.xlu0 %v863_v39 }
  0xed   : > { %2088 = vmatprep.subr.mxu1 %v433_v50  ;;  %v428_v50 = vld [vmem:[%s2640_s24 + $0x188] sm:$0xff] }
  0xee   : > { %2089 = vmatpush3.msra.mxu1 %v417_v54  ;;  %v411_v54 = vld [vmem:[%s2640_s24 + $0x100] sm:$0xff] }
  0xef   : > { %2090 = vmatprep.subr.mxu1 %v432_v59 }
  0xf0   : > { %870 = vmax.xlane.f32.xlu1 %v869_v42  ;;  %v400_v42 = vld [vmem:[%s2640_s24 + $0xa8] sm:$0xff]  ;;  %2091 = vmatpush3.msra.mxu1 %v416_v62 }
  0xf1   : > { %2052 = vmatprep.subr.mxu0 %v400_v42  ;;  %2092 = vmatprep.subr.mxu1 %v431_v2 }
  0xf2   : > { %2053 = vmatpush3.msra.mxu0 %v384_v45  ;;  %2093 = vmatpush3.msra.mxu1 %v415_v7 }
  0xf3   : > { %2054 = vmatprep.subr.mxu0 %v399_v49  ;;  %2094 = vmatprep.subr.mxu1 %v430_v14  ;;  %v474_v49 = vld [vmem:[%s2640_s24 + $0x2f8] sm:$0xff] }
  0xf4   : > { %2055 = vmatpush3.msra.mxu0 %v383_v53  ;;  %2095 = vmatpush3.msra.mxu1 %v414_v22  ;;  %v427_v53 = vld [vmem:[%s2640_s24 + $0x180] sm:$0xff] }
  0xf5   : > { %2056 = vmatprep.subr.mxu0 %v398_v58  ;;  %2096 = vmatprep.subr.mxu1 %v429_v33  ;;  %v506_v58 = vld [vmem:[%s2640_s24 + $0x3f8] sm:$0xff] }
  0xf6   : > { %2057 = vmatpush3.msra.mxu0 %v382_v61  ;;  %2097 = vmatpush3.msra.mxu1 %v413_v46 }
  0xf7   : > { %2058 = vmatprep.subr.mxu0 %v397_v1  ;;  %2098 = vmatprep.subr.mxu1 %v428_v50 }
 0x169   : > { %v850_v6 = vpop.xlane.xlu0 %849 }
 0x16a   : > { %v2673_v9 = vmax.f32 %v2666_v3, %v850_v6  ;;  %v381_v6 = vld [vmem:[%s2640_s24 + $0x10] sm:$0xff] }
 0x16b   : > { %2059 = vmatpush3.msra.mxu0 %v381_v6 }
 0x16c   : > { %v880_v16 = vsub.f32 %v2666_v3, %v2673_v9  ;;  %1421 = vst.msk [vmem:[#allocation2] sm:$0xff] %vm337_vm1, %v2673_v9  ;;  %906 = vperm.xlu0 %2276, %v2673_v9   ;;  %2060 = vmatprep.subr.mxu0 %v396_v12  ;;  %v443_v3 = vld [vmem:[%s2640_s24 + $0x200] sm:$0xff] }
 0x16d   : > { %v856_v26 = vpop.xlane.xlu0 %855  ;;  %v853_v27 = vpop.xlane.xlu1 %852  ;;  %2061 = vmatpush3.msra.mxu0 %v380_v17 }
 0x16e   : > { %v2693_v36 = vmax.f32 %v2675_v10, %v856_v26  ;;  %v2696_v39 = vmax.f32 %v2679_v13, %v853_v27  ;;  %2062 = vmatprep.subr.mxu0 %v395_v30 }
 0x16f   : > { %2063 = vmatpush3.msra.mxu0 %v379_v43 }
 0x170   : > { %v882_v47 = vsub.f32 %v2675_v10, %v2693_v36  ;;  %1423 = vst.msk [vmem:[#allocation2 + $0x10] sm:$0xff] %vm337_vm1, %v2693_v36  ;;  %v881_v48 = vsub.f32 %v2679_v13, %v2696_v39  ;;  %1422 = vst.msk [vmem:[#allocation2 + $0x8] sm:$0xff] %vm337_vm1, %v2696_v39  ;;  %916 = vperm.xlu1 %2277, %v2693_v36   ;;  %2108 = vmatprep.subr.mxu0 %v474_v49 }
 0x171   : > { %v859_v51 = vpop.xlane.xlu1 %858  ;;  %v862_v52 = vpop.xlane.xlu0 %861 }
 0x172   : > { %v2720_v55 = vmax.f32 %v2698_v41, %v859_v51  ;;  %v2723_v56 = vmax.f32 %v2702_v44, %v862_v52  ;;  %v412_v52 = vld [vmem:[%s2640_s24 + $0x108] sm:$0xff]  ;;  %v892_v13 = vmul.f32 1.442695, %v882_v47 }
 0x173   : > { %2099 = vmatpush3.msra.mxu1 %v412_v52 }
 0x174   : > { %v883_v63 = vsub.f32 %v2698_v41, %v2720_v55  ;;  %1424 = vst.msk [vmem:[#allocation2 + $0x18] sm:$0xff] %vm337_vm1, %v2720_v55  ;;  %911 = vperm.xlu1 %2277, %v2696_v39   ;;  %v884_v0 = vsub.f32 %v2702_v44, %v2723_v56  ;;  %1425 = vst.msk [vmem:[#allocation2 + $0x20] sm:$0xff] %vm337_vm1, %v2723_v56  ;;  %2100 = vmatprep.subr.mxu1 %v427_v53  ;;  %v473_v53 = vld [vmem:[%s2640_s24 + $0x2f0] sm:$0xff] }
 0x175   : > { %v868_v4 = vpop.xlane.xlu1 %867  ;;  %v865_v5 = vpop.xlane.xlu0 %864  ;;  %2101 = vmatpush3.msra.mxu1 %v411_v54 }
 0x176   : > { %v2747_v8 = vmax.f32 %v2725_v57, %v868_v4  ;;  %v2750_v11 = vmax.f32 %v2729_v60, %v865_v5  ;;  %2146 = vmatprep.subr.mxu1 %v506_v58  ;;  %v894_v9 = vmul.f32 1.442695, %v883_v63 }
 0x178   : > { %921 = vperm.xlu1 %2277, %v2720_v55   ;;  %v886_v26 = vsub.f32 %v2725_v57, %v2747_v8  ;;  %1427 = vst.msk [vmem:[#allocation2 + $0x30] sm:$0xff] %vm337_vm1, %v2747_v8  ;;  %v885_v27 = vsub.f32 %v2729_v60, %v2750_v11  ;;  %1426 = vst.msk [vmem:[#allocation2 + $0x28] sm:$0xff] %vm337_vm1, %v2750_v11  ;;  %v475_v55 = vld [vmem:[%s2640_s24 + $0x300] sm:$0xff] }
 0x179   : > { %v871_v42 = vpop.xlane.xlu1 %870 }
 0x17a   : > { %v2771_v45 = vmax.f32 %v2754_v15, %v871_v42  ;;  %v898_v41 = vmul.f32 1.442695, %v885_v27  ;;  %v900_v36 = vmul.f32 1.442695, %v886_v26  ;;  %v994_v26 = vld [vmem:[#allocation3 + $0x10] sm:$0xff] }
 0x17c   : > { %926 = vperm.xlu1 %2277, %v2723_v56   ;;  %v887_v51 = vsub.f32 %v2754_v15, %v2771_v45  ;;  %1428 = vst.msk [vmem:[#allocation2 + $0x38] sm:$0xff] %vm337_vm1, %v2771_v45  ;;  %v992_v15 = vld [vmem:[#allocation3] sm:$0xff] }
 0x17e   : > { %v902_v39 = vmul.f32 1.442695, %v887_v51 }
 0x180   : > { %936 = vperm.xlu1 %2277, %v2747_v8  }
 0x184   : > { %931 = vperm.xlu1 %2277, %v2750_v11  }
 0x188   : > { %941 = vperm.xlu1 %2277, %v2771_v45  }
 0x1e7   : > { %v907_v59 = vpop.permute.xlu0 %906 }
 0x1e8   : > { %v944_v61 = vsub.f32 %v2588_v18, %v907_v59  ;;  %v945_v62 = vsub.f32 %v2592_v20, %v907_v59 }
 0x1ea   : > { %v960_v1 = vmul.f32 1.442695, %v944_v61  ;;  %v962_v2 = vmul.f32 1.442695, %v945_v62  ;;  %v472_v61 = vld [vmem:[%s2640_s24 + $0x2e8] sm:$0xff] }
 0x1eb   : > { %v917_v4 = vpop.permute.xlu1 %916 }
 0x1ec   : > { %2278 = vpow2.f32 %v960_v1  ;;  %v948_v5 = vsub.f32 %v2590_v19, %v917_v4  ;;  %v949_v6 = vsub.f32 %v2594_v21, %v917_v4  ;;  %v456_v4 = vld [vmem:[%s2640_s24 + $0x268] sm:$0xff] }
 0x1ed   : > { %2280 = vpow2.f32 %v962_v2  ;;  %v490_v2 = vld [vmem:[%s2640_s24 + $0x378] sm:$0xff] }
 0x1ee   : > { %v968_v7 = vmul.f32 1.442695, %v948_v5  ;;  %v970_v12 = vmul.f32 1.442695, %v949_v6  ;;  %v505_v5 = vld [vmem:[%s2640_s24 + $0x3f0] sm:$0xff] }
 0x1ef   : > { %v912_v14 = vpop.permute.xlu1 %911 }
 0x1f0   : > { %2282 = vpow2.f32 %v968_v7  ;;  %v946_v17 = vsub.f32 %v2598_v23, %v912_v14  ;;  %v947_v22 = vsub.f32 %v2602_v25, %v912_v14  ;;  %v471_v14 = vld [vmem:[%s2640_s24 + $0x2e0] sm:$0xff] }
 0x1f1   : > { %2284 = vpow2.f32 %v970_v12 }
 0x1f2   : > { %v964_v18 = vmul.f32 1.442695, %v946_v17  ;;  %v966_v20 = vmul.f32 1.442695, %v947_v22  ;;  %v489_v17 = vld [vmem:[%s2640_s24 + $0x370] sm:$0xff] }
 0x1f3   : > { %v922_v30 = vpop.permute.xlu1 %921 }
 0x1f4   : > { %2286 = vpow2.f32 %v964_v18  ;;  %v950_v33 = vsub.f32 %v2600_v24, %v922_v30  ;;  %v951_v19 = vsub.f32 %v2608_v28, %v922_v30  ;;  %v458_v24 = vld [vmem:[%s2640_s24 + $0x278] sm:$0xff]  ;;  %v455_v18 = vld [vmem:[%s2640_s24 + $0x260] sm:$0xff] }
 0x1f5   : > { %2288 = vpow2.f32 %v966_v20  ;;  %v470_v30 = vld [vmem:[%s2640_s24 + $0x2d8] sm:$0xff] }
 0x1f6   : > { %v972_v21 = vmul.f32 1.442695, %v950_v33  ;;  %v974_v42 = vmul.f32 1.442695, %v951_v19  ;;  %v504_v33 = vld [vmem:[%s2640_s24 + $0x3e8] sm:$0xff] }
 0x1f7   : > { %v927_v43 = vpop.permute.xlu1 %926 }
 0x1f8   : > { %v952_v46 = vsub.f32 %v2610_v29, %v927_v43  ;;  %v953_v23 = vsub.f32 %v2616_v32, %v927_v43  ;;  %2290 = vpow2.f32 %v972_v21  ;;  %v457_v32 = vld [vmem:[%s2640_s24 + $0x270] sm:$0xff]  ;;  %v454_v43 = vld [vmem:[%s2640_s24 + $0x258] sm:$0xff] }
 0x1f9   : > { %v2279_v25 = vpop.eup %2278  ;;  %2292 = vpow2.f32 %v974_v42 }
 0x1fa   : > { %v2281_v49 = vpop.eup %2280  ;;  %v976_v50 = vmul.f32 1.442695, %v952_v46  ;;  %v978_v52 = vmul.f32 1.442695, %v953_v23  ;;  %v503_v46 = vld [vmem:[%s2640_s24 + $0x3e0] sm:$0xff] }
 0x1fb   : > { %1169 = vmatprep.mubr.f32.mxu0 %v2281_v49  ;;  %v937_v28 = vpop.permute.xlu1 %936  ;;  %v1008_v54 = vadd.f32 %v2281_v49, %v2279_v25  ;;  %v469_v49 = vld [vmem:[%s2640_s24 + $0x2d0] sm:$0xff] }
 0x1fc   : > { %v956_v58 = vsub.f32 %v2614_v31, %v937_v28  ;;  %v957_v29 = vsub.f32 %v2620_v34, %v937_v28  ;;  %1170 = vmatmul.mubr.f32.vlgmr.msra.gmra.mxu0 %v2279_v25  ;;  %2294 = vpow2.f32 %v976_v50 }
 0x1fd   : > { %v2283_v59 = vpop.eup %2282  ;;  %2109 = vmatpush3.msra.mxu0 %v458_v24  ;;  %1009 = vadd.xlane.f32.xlu1 %v1008_v54  ;;  %2296 = vpow2.f32 %v978_v52  ;;  %v453_v52 = vld [vmem:[%s2640_s24 + $0x250] sm:$0xff]  ;;  %v487_v24 = vld [vmem:[%s2640_s24 + $0x360] sm:$0xff] }
 0x1fe   : > { %v2285_v62 = vpop.eup %2284  ;;  %v984_v1 = vmul.f32 1.442695, %v956_v58  ;;  %2110 = vmatprep.subr.mxu0 %v473_v53  ;;  %v986_v31 = vmul.f32 1.442695, %v957_v29  ;;  %v452_v58 = vld [vmem:[%s2640_s24 + $0x248] sm:$0xff]  ;;  %v486_v29 = vld [vmem:[%s2640_s24 + $0x358] sm:$0xff] }
 0x1ff   : > { %2111 = vmatpush3.msra.mxu0 %v457_v32  ;;  %1244 = vmatprep.mubr.f32.mxu1 %v2285_v62  ;;  %v932_v34 = vpop.permute.xlu1 %931  ;;  %v1014_v6 = vadd.f32 %v2285_v62, %v2283_v59 }
 0x200   : > { %2112 = vmatprep.subr.mxu0 %v472_v61  ;;  %1245 = vmatmul.mubr.f32.vlgmr.msra.gmra.mxu1 %v2283_v59  ;;  %v954_v7 = vsub.f32 %v2622_v35, %v932_v34  ;;  %v955_v12 = vsub.f32 %v2628_v38, %v932_v34  ;;  %2298 = vpow2.f32 %v984_v1  ;;  %v488_v38 = vld [vmem:[%s2640_s24 + $0x368] sm:$0xff]  ;;  %v467_v59 = vld [vmem:[%s2640_s24 + $0x2c0] sm:$0xff]  ;;  %v501_v61 = vld [vmem:[%s2640_s24 + $0x3d0] sm:$0xff] }
 0x201   : > { %v2287_v22 = vpop.eup %2286  ;;  %2147 = vmatpush3.msra.mxu1 %v490_v2  ;;  %2113 = vmatpush3.msra.mxu0 %v456_v4  ;;  %2300 = vpow2.f32 %v986_v31  ;;  %v451_v2 = vld [vmem:[%s2640_s24 + $0x240] sm:$0xff]  ;;  %v485_v4 = vld [vmem:[%s2640_s24 + $0x350] sm:$0xff]  ;;  %v466_v31 = vld [vmem:[%s2640_s24 + $0x2b8] sm:$0xff] }
 0x202   : > { %v2289_v20 = vpop.eup %2288  ;;  %2148 = vmatprep.subr.mxu1 %v505_v5  ;;  %1015 = vadd.xlane.f32.xlu0 %v1014_v6  ;;  %v980_v35 = vmul.f32 1.442695, %v954_v7  ;;  %v982_v21 = vmul.f32 1.442695, %v955_v12  ;;  %v500_v34 = vld [vmem:[%s2640_s24 + $0x3c8] sm:$0xff]  ;;  %v450_v5 = vld [vmem:[%s2640_s24 + $0x238] sm:$0xff] }
 0x203   : > { %2114 = vmatprep.subr.mxu0 %v471_v14  ;;  %2149 = vmatpush3.msra.mxu1 %v489_v17  ;;  %v942_v19 = vpop.permute.xlu1 %941  ;;  %v1011_v23 = vadd.f32 %v2289_v20, %v2287_v22  ;;  %v484_v6 = vld [vmem:[%s2640_s24 + $0x348] sm:$0xff]  ;;  %v499_v14 = vld [vmem:[%s2640_s24 + $0x3c0] sm:$0xff] }
 0x204   : > { %2115 = vmatpush3.msra.mxu0 %v455_v18  ;;  %1174 = vmatprep.mubr.f32.mxu0 %v2289_v20  ;;  %v958_v42 = vsub.f32 %v2626_v37, %v942_v19  ;;  %v959_v25 = vsub.f32 %v2632_v40, %v942_v19  ;;  %2302 = vpow2.f32 %v980_v35  ;;  %v468_v37 = vld [vmem:[%s2640_s24 + $0x2c8] sm:$0xff]  ;;  %v502_v40 = vld [vmem:[%s2640_s24 + $0x3d8] sm:$0xff]  ;;  %v483_v18 = vld [vmem:[%s2640_s24 + $0x340] sm:$0xff] }
 0x205   : > { %2116 = vmatprep.subr.mxu0 %v470_v30  ;;  %2150 = vmatprep.subr.mxu1 %v504_v33  ;;  %v2291_v50 = vpop.eup %2290  ;;  %2304 = vpow2.f32 %v982_v21  ;;  %v449_v20 = vld [vmem:[%s2640_s24 + $0x230] sm:$0xff]  ;;  %v498_v30 = vld [vmem:[%s2640_s24 + $0x3b8] sm:$0xff]  ;;  %v464_v33 = vld [vmem:[%s2640_s24 + $0x2a8] sm:$0xff] }
 0x206   : > { %2151 = vmatpush3.msra.mxu1 %v488_v38  ;;  %1175 = vmatmul.mubr.f32.gmra.mxu0 %v2287_v22  ;;  %v2293_v28 = vpop.eup %2292  ;;  %v988_v53 = vmul.f32 1.442695, %v958_v42  ;;  %v990_v54 = vmul.f32 1.442695, %v959_v25  ;;  %v465_v22 = vld [vmem:[%s2640_s24 + $0x2b0] sm:$0xff]  ;;  %v448_v35 = vld [vmem:[%s2640_s24 + $0x228] sm:$0xff] }
 0x207   : > { %2117 = vmatpush3.msra.mxu0 %v454_v43  ;;  %2152 = vmatprep.subr.mxu1 %v503_v46  ;;  %v1017_v62 = vadd.f32 %v2293_v28, %v2291_v50  ;;  %v482_v38 = vld [vmem:[%s2640_s24 + $0x338] sm:$0xff]  ;;  %v497_v42 = vld [vmem:[%s2640_s24 + $0x3b0] sm:$0xff]  ;;  %v463_v46 = vld [vmem:[%s2640_s24 + $0x2a0] sm:$0xff] }
 0x208   : > { %1012 = vadd.xlane.f32.xlu0 %v1011_v23  ;;  %2118 = vmatprep.subr.mxu0 %v469_v49  ;;  %2306 = vpow2.f32 %v988_v53  ;;  %v481_v23 = vld [vmem:[%s2640_s24 + $0x330] sm:$0xff]  ;;  %v447_v25 = vld [vmem:[%s2640_s24 + $0x220] sm:$0xff]  ;;  %v496_v49 = vld [vmem:[%s2640_s24 + $0x3a8] sm:$0xff] }
 0x209   : > { %2119 = vmatpush3.msra.mxu0 %v453_v52  ;;  %2153 = vmatpush3.msra.mxu1 %v487_v24  ;;  %v2826_v32 = vpop.eup %2294  ;;  %2308 = vpow2.f32 %v990_v54  ;;  %v480_v52 = vld [vmem:[%s2640_s24 + $0x328] sm:$0xff]  ;;  %v446_v24 = vld [vmem:[%s2640_s24 + $0x218] sm:$0xff] }
 0x20a   : > { %1249 = vmatprep.mubr.f32.mxu1 %v2293_v28  ;;  %2120 = vmatprep.subr.mxu0 %v468_v37  ;;  %v2297_v1 = vpop.eup %2296  ;;  %v495_v28 = vld [vmem:[%s2640_s24 + $0x3a0] sm:$0xff] }
 0x20b   : > { %2154 = vmatprep.subr.mxu1 %v502_v40  ;;  %1250 = vmatmul.mubr.f32.gmra.mxu1 %v2291_v50  ;;  %v1020_v7 = vadd.f32 %v2297_v1, %v2826_v32  ;;  %v462_v50 = vld [vmem:[%s2640_s24 + $0x298] sm:$0xff]  ;;  %v461_v40 = vld [vmem:[%s2640_s24 + $0x290] sm:$0xff] }
 0x20c   : > { %2121 = vmatpush3.msra.mxu0 %v452_v58  ;;  %2155 = vmatpush3.msra.mxu1 %v486_v29  ;;  %v445_v58 = vld [vmem:[%s2640_s24 + $0x210] sm:$0xff]  ;;  %v479_v29 = vld [vmem:[%s2640_s24 + $0x320] sm:$0xff] }
 0x20d   : > { %2122 = vmatprep.subr.mxu0 %v467_v59  ;;  %2156 = vmatprep.subr.mxu1 %v501_v61  ;;  %v2837_v12 = vpop.eup %2298  ;;  %v888_v59 = vmul.f32 1.442695, %v880_v16  ;;  %v460_v61 = vld [vmem:[%s2640_s24 + $0x288] sm:$0xff]  ;;  %v477_v16 = vld [vmem:[%s2640_s24 + $0x310] sm:$0xff] }
 0x20e   : > { %1018 = vadd.xlane.f32.xlu1 %v1017_v62  ;;  %2123 = vmatpush3.msra.mxu0 %v451_v2  ;;  %v2301_v17 = vpop.eup %2300  ;;  %v494_v62 = vld [vmem:[%s2640_s24 + $0x398] sm:$0xff] }
 0x20f   : > { %2157 = vmatpush3.msra.mxu1 %v485_v4  ;;  %2124 = vmatprep.subr.mxu0 %v466_v31  ;;  %v1026_v19 = vadd.f32 %v2301_v17, %v2837_v12  ;;  %v478_v2 = vld [vmem:[%s2640_s24 + $0x318] sm:$0xff]  ;;  %v459_v4 = vld [vmem:[%s2640_s24 + $0x280] sm:$0xff]  ;;  %v493_v31 = vld [vmem:[%s2640_s24 + $0x390] sm:$0xff]  ;;  %2310 = vpow2.f32 %v888_v59 }
 0x210   : > { %1319 = vmatprep.mubr.f32.mxu0 %v2297_v1  ;;  %2158 = vmatprep.subr.mxu1 %v500_v34  ;;  %v444_v1 = vld [vmem:[%s2640_s24 + $0x208] sm:$0xff]  ;;  %2312 = vpow2.f32 %v894_v9  ;;  %v999_v59 = vld [vmem:[#allocation3 + $0x38] sm:$0xff] }
 0x211   : > { %2125 = vmatpush3.msra.mxu0 %v450_v5  ;;  %2159 = vmatpush3.msra.mxu1 %v484_v6  ;;  %v2848_v21 = vpop.eup %2302  ;;  %v890_v5 = vmul.f32 1.442695, %v881_v48  ;;  %v492_v6 = vld [vmem:[%s2640_s24 + $0x388] sm:$0xff]  ;;  %v896_v48 = vmul.f32 1.442695, %v884_v0 }
 0x212   : > { %2160 = vmatprep.subr.mxu1 %v499_v14  ;;  %1021 = vadd.xlane.f32.xlu0 %v1020_v7  ;;  %v2305_v43 = vpop.eup %2304  ;;  %v476_v7 = vld [vmem:[%s2640_s24 + $0x308] sm:$0xff]  ;;  %v491_v14 = vld [vmem:[%s2640_s24 + $0x380] sm:$0xff]  ;;  %s1876_s24 = sshll.u32 %s301_s17, 4  ;;  %s2966_s24 = int_to_ptr.vmem [resolvable:$true] %s1876_s24 }
 0x213   : > { %2126 = vmatprep.subr.mxu0 %v465_v22  ;;  %2161 = vmatpush3.msra.mxu1 %v483_v18  ;;  %v1023_v37 = vadd.f32 %v2305_v43, %v2848_v21  ;;  %2314 = vpow2.f32 %v890_v5  ;;  %s2342_s7 = scalar_lea.vmem %s2966_s24, 256  ;;  %p2349_p1 = scmp.lt.s32.totalorder %s2966_s24, %s2347_s9 }
 0x214   : > { %2127 = vmatpush3.msra.mxu0 %v449_v20  ;;  %2162 = vmatprep.subr.mxu1 %v498_v30  ;;  %2316 = vpow2.f32 %v898_v41  ;;  %v995_v30 = vld [vmem:[#allocation3 + $0x18] sm:$0xff]  ;;  %p2343_p12 = scmp.ne.s32.totalorder %s2966_s24, %s2342_s7  ;;  %p2350_p2 = scmp.lt.s32.totalorder %s2348_s10, %s2342_s7 }
 0x215   : > { %2128 = vmatprep.subr.mxu0 %v464_v33  ;;  %1394 = vmatprep.mubr.f32.mxu1 %v2301_v17  ;;  %v2307_v53 = vpop.eup %2306  ;;  %2318 = vpow2.f32 %v892_v13  ;;  %v2925_v41 = vld [vmem:[%s3020_s3 + $0x18] sm:$0xff] }
 0x216   : > { %2129 = vmatpush3.msra.mxu0 %v448_v35  ;;  %2163 = vmatpush3.msra.mxu1 %v482_v38  ;;  %v2309_v54 = vpop.eup %2308  ;;  %2320 = vpow2.f32 %v902_v39  ;;  %p2344_p13 = pnand %p2343_p12, %p2496_p4  ;;  %p2351_p3 = por %p2350_p2, %p2349_p1 }
 0x217   : > { %2164 = vmatprep.subr.mxu1 %v497_v42  ;;  %1027 = vadd.xlane.f32.xlu0 %v1026_v19  ;;  %v1029_v34 = vadd.f32 %v2309_v54, %v2307_v53  ;;  %2322 = vpow2.f32 %v896_v48  ;;  %v996_v19 = vld [vmem:[#allocation3 + $0x20] sm:$0xff] }
 0x218   : > { %2130 = vmatprep.subr.mxu0 %v463_v46  ;;  %2165 = vmatpush3.msra.mxu1 %v481_v23  ;;  %2324 = vpow2.f32 %v900_v36  ;;  %p2345_p0 = pneg %p2344_p13 }
 0x219   : > { %2131 = vmatpush3.msra.mxu0 %v447_v25  ;;  %2166 = vmatprep.subr.mxu1 %v496_v49  ;;  %v998_v25 = vld [vmem:[#allocation3 + $0x30] sm:$0xff] }
 0x21a   : > { %2132 = vmatprep.subr.mxu0 %v462_v50  ;;  %2167 = vmatpush3.msra.mxu1 %v480_v52  ;;  %p2352_p5 = pnand %p2351_p3, %p2345_p0 }
 0x21b   : > { %2133 = vmatpush3.msra.mxu0 %v446_v24  ;;  %2168 = vmatprep.subr.mxu1 %v495_v28  ;;  %v997_v28 = vld [vmem:[#allocation3 + $0x28] sm:$0xff] }
 0x21c   : > { %2134 = vmatprep.subr.mxu0 %v461_v40  ;;  %1024 = vadd.xlane.f32.xlu1 %v1023_v37  ;;  %v2311_v10 = vpop.eup %2310 }
 0x21d   : > { %2135 = vmatpush3.msra.mxu0 %v445_v58  ;;  %2169 = vmatpush3.msra.mxu1 %v479_v29  ;;  %v2313_v47 = vpop.eup %2312  ;;  %v1000_v27 = vmul.f32 %v2311_v10, %v992_v15 }
 0x21e   : > { %2136 = vmatprep.subr.mxu0 %v460_v61  ;;  %2170 = vmatprep.subr.mxu1 %v494_v62  ;;  %v1003_v35 = vmul.f32 %v2313_v47, %v995_v30  ;;  %v1504_v61 = vld [vmem:[%s3020_s3] sm:$0xff] }
 0x21f   : > { %2137 = vmatpush3.msra.mxu0 %v444_v1  ;;  %2171 = vmatpush3.msra.mxu1 %v478_v2 }
 0x220   : > { %2138 = vmatprep.subr.mxu0 %v459_v4  ;;  %2172 = vmatprep.subr.mxu1 %v493_v31  ;;  %v2315_v60 = vpop.eup %2314 }
 0x221   : > { %1030 = vadd.xlane.f32.xlu1 %v1029_v34  ;;  %2139 = vmatpush3.msra.mxu0 %v443_v3  ;;  %v2317_v63 = vpop.eup %2316  ;;  %v1505_v34 = vld [vmem:[%s3020_s3 + $0x8] sm:$0xff] }
 0x222   : > { %2173 = vmatpush3.msra.mxu1 %v477_v16  ;;  %1320 = vmatmul.mubr.f32.vlgmr.msra.gmra.mxu0 %v2826_v32  ;;  %v2319_v11 = vpop.eup %2318  ;;  %v1005_v40 = vmul.f32 %v2317_v63, %v997_v28 }
 0x223   : > { %2174 = vmatprep.subr.mxu1 %v492_v6  ;;  %1324 = vmatprep.mubr.f32.mxu0 %v2305_v43  ;;  %v2321_v44 = vpop.eup %2320  ;;  %v1002_v45 = vmul.f32 %v2319_v11, %v994_v26  ;;  %v2919_v6 = vld [vmem:[%s3020_s3 + $0x10] sm:$0xff] }
 0x224   : > { %2175 = vmatpush3.msra.mxu1 %v476_v7  ;;  %v2323_v56 = vpop.eup %2322  ;;  %2196 = vmatprep.subr.mxu0 %v1504_v61  ;;  %v1007_v1 = vmul.f32 %v2321_v44, %v999_v59  ;;  %v1056_v59 = vld [vmem:[#allocation4 + $0x38] sm:$0xff] }
 0x225   : > { %2176 = vmatprep.subr.mxu1 %v491_v14  ;;  %v2325_v0 = vpop.eup %2324  ;;  %v1004_v42 = vmul.f32 %v2323_v56, %v996_v19  ;;  %2197 = vmatpush3.msra.mxu0 %v1504_v61  ;;  %v1053_v19 = vld [vmem:[#allocation4 + $0x20] sm:$0xff] }
 0x226   : > { %2177 = vmatpush3.msra.mxu1 %v475_v55  ;;  %1325 = vmatmul.mubr.f32.gmra.mxu0 %v2848_v21  ;;  %v1006_v50 = vmul.f32 %v2325_v0, %v998_v25  ;;  %v1049_v55 = vld [vmem:[#allocation4] sm:$0xff]  ;;  %v1054_v25 = vld [vmem:[#allocation4 + $0x28] sm:$0xff] }
 0x227   : > { %1395 = vmatmul.mubr.f32.vlgmr.msra.gmra.mxu1 %v2837_v12  ;;  %v993_v12 = vld [vmem:[#allocation3 + $0x8] sm:$0xff]  ;;  %2201 = vmatprep.subr.mxu1 %v1505_v34 }
 0x228   : > { %1399 = vmatprep.mubr.f32.mxu1 %v2309_v54  ;;  %v1001_v17 = vmul.f32 %v2315_v60, %v993_v12  ;;  %2202 = vmatpush3.msra.mxu1 %v1505_v34  ;;  %v1052_v12 = vld [vmem:[#allocation4 + $0x18] sm:$0xff] }
 0x229   : > { %2206 = vmatprep.subr.mxu0 %v2919_v6  ;;  %2211 = vmatprep.subr.mxu1 %v2925_v41 }
 0x22b   : > { %1400 = vmatmul.mubr.f32.gmra.mxu1 %v2307_v53 }
 0x22d   : > { %1059 = vperm.xlu0 %2276, %v2311_v10  }
 0x231   : > { %1074 = vperm.xlu0 %2276, %v2313_v47  }
 0x232   : > { %1064 = vperm.xlu1 %2277, %v2315_v60   ;;  %v1051_v60 = vld [vmem:[#allocation4 + $0x10] sm:$0xff] }
 0x235   : > { %1084 = vperm.xlu0 %2276, %v2317_v63  }
 0x236   : > { %1069 = vperm.xlu1 %2277, %v2319_v11  }
 0x239   : > { %1094 = vperm.xlu0 %2276, %v2321_v44  }
 0x23a   : > { %1079 = vperm.xlu1 %2277, %v2323_v56  }
 0x23e   : > { %1089 = vperm.xlu1 %2277, %v2325_v0  }
 0x286   : > { %v1010_v57 = vpop.xlane.xlu1 %1009 }
 0x287   : > { %v1032_v8 = vadd.f32 %v1010_v57, %v1000_v27 }
 0x289   : > { %1041 = vst.msk [vmem:[#allocation3] sm:$0xff] %vm337_vm1, %v1032_v8  ;;  %v1050_v8 = vld [vmem:[#allocation4 + $0x8] sm:$0xff] }
 0x28b   : > { %v1016_v51 = vpop.xlane.xlu0 %1015 }
 0x28c   : > { %v1034_v32 = vadd.f32 %v1016_v51, %v1002_v45 }
 0x28e   : > { %1043 = vst.msk [vmem:[#allocation3 + $0x10] sm:$0xff] %vm337_vm1, %v1034_v32 }
 0x290   : > { %v1432_v22 = vld [vmem:[#allocation3] sm:$0xff] }
 0x291   : > { %v1013_v18 = vpop.xlane.xlu0 %1012  ;;  %2326 = vrcp.f32 %v1432_v22 }
 0x292   : > { %v1033_v20 = vadd.f32 %v1013_v18, %v1001_v17 }
 0x294   : > { %1042 = vst.msk [vmem:[#allocation3 + $0x8] sm:$0xff] %vm337_vm1, %v1033_v20 }
 0x295   : > { %v1434_v33 = vld [vmem:[#allocation3 + $0x10] sm:$0xff] }
 0x296   : > { %2328 = vrcp.f32 %v1434_v33 }
 0x297   : > { %v1019_v38 = vpop.xlane.xlu1 %1018 }
 0x298   : > { %v1035_v21 = vadd.f32 %v1019_v38, %v1003_v35 }
 0x29a   : > { %1044 = vst.msk [vmem:[#allocation3 + $0x18] sm:$0xff] %vm337_vm1, %v1035_v21 }
 0x29b   : > { %v1022_v43 = vpop.xlane.xlu0 %1021  ;;  %v1433_v46 = vld [vmem:[#allocation3 + $0x8] sm:$0xff] }
 0x29c   : > { %v1036_v23 = vadd.f32 %v1022_v43, %v1004_v42  ;;  %2330 = vrcp.f32 %v1433_v46 }
 0x29e   : > { %v2327_v49 = vpop.eup %2326  ;;  %1045 = vst.msk [vmem:[#allocation3 + $0x20] sm:$0xff] %vm337_vm1, %v1036_v23 }
 0x29f   : > { %1458 = vperm.xlu1 %2277, %v2327_v49  }
 0x2a0   : > { %v1028_v52 = vpop.xlane.xlu0 %1027 }
 0x2a1   : > { %v1038_v24 = vadd.f32 %v1028_v52, %v1006_v50  ;;  %v1435_v37 = vld [vmem:[#allocation3 + $0x18] sm:$0xff]  ;;  %v1055_v50 = vld [vmem:[#allocation4 + $0x30] sm:$0xff] }
 0x2a2   : > { %2332 = vrcp.f32 %v1435_v37 }
 0x2a3   : > { %v2329_v53 = vpop.eup %2328  ;;  %1047 = vst.msk [vmem:[#allocation3 + $0x30] sm:$0xff] %vm337_vm1, %v1038_v24 }
 0x2a4   : > { %1468 = vperm.xlu1 %2277, %v2329_v53  }
 0x2a5   : > { %v1025_v54 = vpop.xlane.xlu1 %1024  ;;  %v1436_v58 = vld [vmem:[#allocation3 + $0x20] sm:$0xff] }
 0x2a6   : > { %v1037_v29 = vadd.f32 %v1025_v54, %v1005_v40  ;;  %2334 = vrcp.f32 %v1436_v58 }
 0x2a8   : > { %1046 = vst.msk [vmem:[#allocation3 + $0x28] sm:$0xff] %vm337_vm1, %v1037_v29  ;;  %v1060_v13 = vpop.permute.xlu0 %1059 }
 0x2a9   : > { %v2331_v62 = vpop.eup %2330  ;;  %v1097_v36 = vmul.f32 %v1060_v13, %v1049_v55 }
 0x2aa   : > { %v1031_v2 = vpop.xlane.xlu1 %1030  ;;  %1463 = vperm.xlu0 %2276, %v2331_v62   ;;  %v1438_v4 = vld [vmem:[#allocation3 + $0x30] sm:$0xff] }
 0x2ab   : > { %v1039_v31 = vadd.f32 %v1031_v2, %v1007_v1  ;;  %2336 = vrcp.f32 %v1438_v4 }
 0x2ac   : > { %v1075_v17 = vpop.permute.xlu0 %1074 }
 0x2ad   : > { %1048 = vst.msk [vmem:[#allocation3 + $0x38] sm:$0xff] %vm337_vm1, %v1039_v31  ;;  %v1100_v30 = vmul.f32 %v1075_v17, %v1052_v12 }
 0x2ae   : > { %v1065_v14 = vpop.permute.xlu1 %1064 }
 0x2af   : > { %v2333_v3 = vpop.eup %2332  ;;  %v1437_v9 = vld [vmem:[#allocation3 + $0x28] sm:$0xff]  ;;  %v1098_v51 = vmul.f32 %v1065_v14, %v1050_v8 }
 0x2b0   : > { %1473 = vperm.xlu0 %2276, %v2333_v3   ;;  %2338 = vrcp.f32 %v1437_v9  ;;  %v1085_v43 = vpop.permute.xlu0 %1084 }
 0x2b1   : > { %v1102_v53 = vmul.f32 %v1085_v43, %v1054_v25 }
 0x2b2   : > { %v1070_v63 = vpop.permute.xlu1 %1069 }
 0x2b3   : > { %v2335_v16 = vpop.eup %2334  ;;  %v1099_v15 = vmul.f32 %v1070_v63, %v1051_v60 }
 0x2b4   : > { %1478 = vperm.xlu1 %2277, %v2335_v16   ;;  %v1439_v5 = vld [vmem:[#allocation3 + $0x38] sm:$0xff]  ;;  %v1095_v61 = vpop.permute.xlu0 %1094 }
 0x2b5   : > { %2340 = vrcp.f32 %v1439_v5  ;;  %v1104_v31 = vmul.f32 %v1095_v61, %v1056_v59 }
 0x2b6   : > { %v1080_v38 = vpop.permute.xlu1 %1079 }
 0x2b7   : > { %v1101_v46 = vmul.f32 %v1080_v38, %v1053_v19 }
 0x2b8   : > { %v2337_v7 = vpop.eup %2336 }
 0x2b9   : > { %1488 = vperm.xlu1 %2277, %v2337_v7  }
 0x2ba   : > { %v1090_v52 = vpop.permute.xlu1 %1089 }
 0x2bb   : > { %v1103_v58 = vmul.f32 %v1090_v52, %v1055_v50 }
 0x2bc   : > { %v2064_v39 = vpop.f32.mrf.mxu0 }
 0x2bd   : > { %v2339_v48 = vpop.eup %2338 }
 0x2be   : > { %1483 = vperm.xlu0 %2276, %v2339_v48   ;;  %v2065_v10 = vpop.f32.mrf.mxu0 }
 0x2bf   : > { %v2066_v47 = vadd.f32 %v2065_v10, %v2064_v39 }
 0x2c0   : > { %v2102_v11 = vpop.f32.mrf.mxu1 }
 0x2c1   : > { %v1405_v44 = vadd.f32 %v2066_v47, %v1097_v36 }
 0x2c2   : > { %v2341_v56 = vpop.eup %2340  ;;  %v2103_v0 = vpop.f32.mrf.mxu1 }
 0x2c3   : > { %1493 = vperm.xlu0 %2276, %v2341_v56   ;;  %1413 = vst.msk [vmem:[#allocation4] sm:$0xff] %vm354_vm0, %v1405_v44  ;;  %v2104_v27 = vadd.f32 %v2103_v0, %v2102_v11 }
 0x2c5   : > { %v1407_v57 = vadd.f32 %v2104_v27, %v1099_v15 }
 0x2c6   : > { %v2067_v26 = vpop.f32.mrf.mxu0 }
 0x2c7   : > { %1415 = vst.msk [vmem:[#allocation4 + $0x10] sm:$0xff] %vm354_vm0, %v1407_v57 }
 0x2c8   : > { %v2068_v45 = vpop.f32.mrf.mxu0 }
 0x2c9   : > { %v2069_v32 = vadd.f32 %v2068_v45, %v2067_v26 }
 0x2ca   : > { %v1448_v16 = vld [vmem:[#allocation4] sm:$0xff] }
 0x2cb   : > { %v1406_v22 = vadd.f32 %v2069_v32, %v1098_v51  ;;  %v2105_v18 = vpop.f32.mrf.mxu1 }
 0x2cd   : > { %1414 = vst.msk [vmem:[#allocation4 + $0x8] sm:$0xff] %vm354_vm0, %v1406_v22  ;;  %v2106_v20 = vpop.f32.mrf.mxu1 }
 0x2ce   : > { %v2107_v33 = vadd.f32 %v2106_v20, %v2105_v18  ;;  %v1450_v7 = vld [vmem:[#allocation4 + $0x10] sm:$0xff] }
 0x2d0   : > { %v1408_v35 = vadd.f32 %v2107_v33, %v1100_v30 }
 0x2d2   : > { %1416 = vst.msk [vmem:[#allocation4 + $0x18] sm:$0xff] %vm354_vm0, %v1408_v35 }
 0x2d4   : > { %v1449_v13 = vld [vmem:[#allocation4 + $0x8] sm:$0xff] }
 0x2d9   : > { %v1451_v10 = vld [vmem:[#allocation4 + $0x18] sm:$0xff] }
 0x2e2   : > { %v2140_v21 = vpop.f32.mrf.mxu0 }
 0x2e4   : > { %v2141_v42 = vpop.f32.mrf.mxu0 }
 0x2e5   : > { %v2142_v23 = vadd.f32 %v2141_v42, %v2140_v21 }
 0x2e6   : > { %v2143_v49 = vpop.f32.mrf.mxu0 }
 0x2e7   : > { %v1409_v24 = vadd.f32 %v2142_v23, %v1101_v46  ;;  %v2178_v28 = vpop.f32.mrf.mxu1  ;;  %v2022_v46 = vld [vmem:[%s3021_s4] ss:$0 sm:$0xff] }
 0x2e8   : > { %v2144_v37 = vpop.f32.mrf.mxu0 }
 0x2e9   : > { %1417 = vst.msk [vmem:[#allocation4 + $0x20] sm:$0xff] %vm354_vm0, %v1409_v24  ;;  %v2145_v40 = vadd.f32 %v2144_v37, %v2143_v49  ;;  %v2179_v54 = vpop.f32.mrf.mxu1 }
 0x2ea   : > { %v2180_v29 = vadd.f32 %v2179_v54, %v2178_v28 }
 0x2eb   : > { %v1410_v62 = vadd.f32 %v2145_v40, %v1102_v53  ;;  %v2181_v1 = vpop.f32.mrf.mxu1 }
 0x2ec   : > { %v1411_v2 = vadd.f32 %v2180_v29, %v1103_v58 }
 0x2ed   : > { %1418 = vst.msk [vmem:[#allocation4 + $0x28] sm:$0xff] %vm354_vm0, %v1410_v62  ;;  %v2182_v4 = vpop.f32.mrf.mxu1 }
 0x2ee   : > { %1419 = vst.msk [vmem:[#allocation4 + $0x30] sm:$0xff] %vm354_vm0, %v1411_v2  ;;  %v2183_v34 = vadd.f32 %v2182_v4, %v2181_v1 }
 0x2f0   : > { %v1412_v3 = vadd.f32 %v2183_v34, %v1104_v31  ;;  %v1452_v60 = vld [vmem:[#allocation4 + $0x20] sm:$0xff] }
 0x2f2   : > { %1420 = vst.msk [vmem:[#allocation4 + $0x38] sm:$0xff] %vm354_vm0, %v1412_v3 }
 0x2f4   : > { %v1453_v15 = vld [vmem:[#allocation4 + $0x28] sm:$0xff] }
 0x2f5   : > { %v1454_v44 = vld [vmem:[#allocation4 + $0x30] sm:$0xff] }
 0x2f9   : > { %v1455_v57 = vld [vmem:[#allocation4 + $0x38] sm:$0xff] }
 0x31a   : > { %v1459_v9 = vpop.permute.xlu1 %1458 }
 0x31b   : > { %v1496_v5 = vmul.f32 %v1459_v9, %v1448_v16 }
 0x31d   : > { %2198 = vmatprep.mubr.msk.f32.mxu0 %vm354_vm0, %v1496_v5 }
 0x31f   : > { %v1469_v14 = vpop.permute.xlu1 %1468 }
 0x320   : > { %v1498_v55 = vmul.f32 %v1469_v14, %v1450_v7 }
 0x322   : > { %2203 = vmatprep.mubr.msk.f32.mxu1 %vm354_vm0, %v1498_v55 }
 0x325   : > { %v1464_v39 = vpop.permute.xlu0 %1463 }
 0x326   : > { %v1497_v48 = vmul.f32 %v1464_v39, %v1449_v13 }
 0x328   : > { %2199 = vmatmul.mubr.msk.f32.vlgmr.msra.gmra.mxu0 %vm354_vm0, %v1497_v48 }
 0x329   : > { %2207 = vmatpush3.msra.mxu0 %v2919_v6 }
 0x32b   : > { %v1474_v36 = vpop.permute.xlu0 %1473 }
 0x32c   : > { %v1499_v47 = vmul.f32 %v1474_v36, %v1451_v10 }
 0x32e   : > { %2204 = vmatmul.mubr.msk.f32.vlgmr.msra.gmra.mxu1 %vm354_vm0, %v1499_v47 }
 0x32f   : > { %v1479_v63 = vpop.permute.xlu1 %1478  ;;  %2212 = vmatpush3.msra.mxu1 %v2925_v41 }
 0x330   : > { %v1500_v11 = vmul.f32 %v1479_v63, %v1452_v60 }
 0x332   : > { %2208 = vmatprep.mubr.msk.f32.mxu0 %vm354_vm0, %v1500_v11 }
 0x334   : > { %v1489_v56 = vpop.permute.xlu1 %1488 }
 0x335   : > { %v1502_v0 = vmul.f32 %v1489_v56, %v1454_v44 }
 0x337   : > { %2213 = vmatprep.mubr.msk.f32.mxu1 %vm354_vm0, %v1502_v0 }
 0x339   : > { %v1484_v6 = vpop.permute.xlu0 %1483 }
 0x33a   : > { %v1501_v27 = vmul.f32 %v1484_v6, %v1453_v15 }
 0x33c   : > { %2209 = vmatmul.mubr.msk.f32.vlgmr.msra.gmra.mxu0 %vm354_vm0, %v1501_v27 }
 0x33e   : > { %v1494_v8 = vpop.permute.xlu0 %1493 }
 0x33f   : > { %v1503_v26 = vmul.f32 %v1494_v8, %v1455_v57 }
 0x341   : > { %2214 = vmatmul.mubr.msk.f32.vlgmr.msra.gmra.mxu1 %vm354_vm0, %v1503_v26 }
 0x3e8   : > { %v2200_v41 = vpop.f32.mrf.mxu0 }
 0x3e9   : > { %v1840_v22 = vsel %vm1832_vm2, %v2200_v41, 0.0 }
 0x3ea   : > { %v1580_v51 = vpop.f32.mrf.mxu0 }
 0x3eb   : > { %v1833_v35 = vsel %vm1832_vm2, %v1580_v51, 0.0 }
 0x3ee   : > { %v2205_v45 = vpop.f32.mrf.mxu1 }
 0x3ef   : > { %v1841_v12 = vsel %vm1832_vm2, %v2205_v45, 0.0 }
 0x3f0   : > { %v1661_v32 = vpop.f32.mrf.mxu1  ;;  %v1842_v33 = vadd.f32 %v1841_v12, %v1840_v22 }
 0x3f1   : > { %v1834_v18 = vsel %vm1832_vm2, %v1661_v32, 0.0 }
 0x3f2   : > { %v1835_v19 = vadd.f32 %v1834_v18, %v1833_v35 }
 0x3fc   : > { %v2210_v17 = vpop.f32.mrf.mxu0 }
 0x3fd   : > { %v1843_v20 = vsel %vm1832_vm2, %v2210_v17, 0.0 }
 0x3fe   : > { %v1742_v30 = vpop.f32.mrf.mxu0  ;;  %v1844_v21 = vadd.f32 %v1843_v20, %v1842_v33 }
 0x3ff   : > { %v1836_v38 = vsel %vm1832_vm2, %v1742_v30, 0.0 }
 0x400   : > { %v1837_v23 = vadd.f32 %v1836_v38, %v1835_v19 }
 0x401   : > { %v2215_v42 = vpop.f32.mrf.mxu1 }
 0x402   : > { %v1845_v43 = vsel %vm1832_vm2, %v2215_v42, 0.0 }
 0x403   : > { %v1846_v25 = vadd.f32 %v1845_v43, %v1844_v21  ;;  %v1823_v49 = vpop.f32.mrf.mxu1 }
 0x404   : > { %v1838_v50 = vsel %vm1832_vm2, %v1823_v49, 0.0 }
 0x405   : > { %v1855_v52 = vadd.f32 %v2022_v46, %v1846_v25  ;;  %v1839_v24 = vadd.f32 %v1838_v50, %v1837_v23 }
 0x407   : > { %v1857_v28 = vmax.f32 %v1855_v52, 0.0  ;;  %v1854_v37 = vadd.f32 %v2022_v46, %v1839_v24 }
 0x409   : > { %1859 = vst.msk [vmem:[%s301_s17 + $0x8] sm:$0xff] %vm1832_vm2, %v1857_v28  ;;  %v1856_v53 = vmax.f32 %v1854_v37, 0.0 }
 0x40b   : > { %1858 = vst.msk [vmem:[%s301_s17] sm:$0xff] %vm1832_vm2, %v1856_v53 }
 0x40c   : > { %2355 = shalt.err (!%p2352_p5)
}
 0x40d   : > { %s2356_s11 = scalar_lea.hbm %s2964_s29, 256  ;;  %s2360_s14 = scalar_lea.hbm %s3022_s5, 512 }
 0x40e   : > { %p2357_p6 = scmp.ne.s32.totalorder %s2964_s29, %s2356_s11  ;;  %p2361_p10 = scmp.lt.s32.totalorder %s2964_s29, %s3022_s5 }
 0x40f   : > { %p2362_p11 = scmp.lt.s32.totalorder %s2360_s14, %s2356_s11 }
 0x410   : > { %p2358_p7 = pnand %p2357_p6, %p2496_p4 }
 0x411   : > { %p2363_p12 = por %p2362_p11, %p2361_p10 }
 0x412   : > { %p2359_p9 = pneg %p2358_p7 }
 0x414   : > { %p2364_p13 = pnand %p2363_p12, %p2359_p9 }
 0x416   : > { %2367 = shalt.err (!%p2364_p13)
}
 0x417   : > { %s2424_s17 = smov 128   ;;  %s2425_s25 = smov 8  }
 0x418   : > { %2216 = dma.vmem_to_hbm [thread:$0]  (%p2496_p4), %s2966_s24, 256, %s2964_s29, %s2972_s21, %s2424_s17, %s2424_s17, %s2425_s25  }
 0x419 PF: > { %p2222_p0 = scmp.ge.s32.totalorder %s2418_s23, 2  ;;  %s1891_s27 = sand.u32 1, %s2398_s18  }
 0x41a   : > { %s1892_s7 = scalar_lea.sflag [#allocation6], %s1891_s27 }
 0x41b   : > { %p2219_p1 = pnand %p2222_p0, %p2503_p8 }
 0x41d   : > { %p2220_p2 = pneg %p2219_p1 }
 0x41f   : > { %2393 = dma.done.wait (%p2220_p2), %s1892_s7, 256  }
 0x420   : > { %2395 = vsyncadd (%p2220_p2), %s1892_s7, 4294967040  ;;  %s18_s23 = sadd.s32 1, %s2418_s23   ;;  %s3025_s18 = smov %s2402_s19 }
 0x421   : > { %p15_p3 = scmp.ge.s32.totalorder %s18_s23, 4   ;;  %s3026_s19 = smov %s2406_s20 }
 0x422   : > { %s3027_s20 = smov %s2509_s6  ;;  %s3028_s21 = smov %s2414_s22 }
 0x423   : > { %s3029_s22 = smov %s3031_s26  ;;  %17 = sbr.rel (!%p15_p3) target bundleno = 4 (0x4), region = 89 }
 0x428   :  { %1897 = vsyncpa [#allocation6], 1 }
 0x429   :  { %1899 = vsyncpa [#allocation6 + $0x1], 1 }

</bundles_post_ra>
